<compile_context>
chip_gen: v5e
topology: v5e:2x2
jax: 0.10.0
libtpu: 0.0.40
codegen_flags: <defaults>
</compile_context>

<pallas_src>
import jax
import jax.numpy as jnp
from jax import lax
from jax.experimental import pallas as pl
from jax.experimental.pallas import tpu as pltpu


# ----------------------------------------------------------------------------
# Lane-shift helper: feature-detect pltpu.roll support / direction once.
# ----------------------------------------------------------------------------
_ROLL_MODE = "concat"      # safe default; upgraded by _detect_lane_roll()


def _roll_probe_kernel(x_ref, o_ref):
    o_ref[...] = pltpu.roll(x_ref[...], 240, axis=1)


def _detect_lane_roll():
    """Probe pltpu.roll on this backend; fall back to slice+concat if unsupported."""
    global _ROLL_MODE
    try:
        x = jnp.arange(4 * 256, dtype=jnp.float32).reshape(4, 256)
        y = pl.pallas_call(
            _roll_probe_kernel,
            out_shape=jax.ShapeDtypeStruct((4, 256), jnp.float32),
        )(x)
        if bool(jnp.all(y == jnp.roll(x, 240, axis=1))):
            _ROLL_MODE = "roll"        # pltpu.roll(x, k) == jnp.roll(x, k)
        elif bool(jnp.all(y == jnp.roll(x, -240, axis=1))):
            _ROLL_MODE = "roll_inv"    # pltpu.roll(x, k) == jnp.roll(x, -k)
        else:
            _ROLL_MODE = "concat"
    except Exception:
        _ROLL_MODE = "concat"


def _shift(x, s):
    """y[:, l] = x[:, (l + s) mod M].  Wrapped lanes are zeroed by the caller's mask."""
    m = x.shape[-1]
    s = s % m
    if s == 0:
        return x
    if m % 128 == 0 and _ROLL_MODE != "concat":
        amount = (m - s) if _ROLL_MODE == "roll" else s
        return pltpu.roll(x, amount, axis=1)          # XLU lane rotate (vector-extended slot)
    # Sub-vreg lane width (8x8 stage: 64 lanes) or no rotate support: slice+concat fallback.
    return jnp.concatenate([x[:, s:], x[:, :s]], axis=-1)


# ----------------------------------------------------------------------------
# In-kernel helpers
# ----------------------------------------------------------------------------
def _gelu(x):
    # TODO(synk): nn.GELU() defaults to the exact erf GELU; erf lowering is not guaranteed in
    # Mosaic, so the standard tanh approximation is used (the reference below uses the same).
    c = 0.7978845608028654  # sqrt(2/pi)
    return 0.5 * x * (1.0 + jnp.tanh(c * (x + 0.044715 * x * x * x)))


def _stack_taps(x, mask_ref, taps):
    """Stack shifted+masked copies of x along sublanes -> (len(taps)*Cin, M).

    taps: sequence of (lane_shift, mask_row or None); mask_row indexes mask_ref (None = all ones).
    """
    parts = []
    for s, mi in taps:
        xs = _shift(x, s)
        if mi is not None:
            xs = xs * mask_ref[mi:mi + 1, :]
        parts.append(xs)
    return jnp.concatenate(parts, axis=0)


def _conv3x3_same(x, w_ref, b_ref, mask_ref, width, act):
    """3x3 'same' conv on a lane-flattened (Cin, H*W) image as ONE bf16 MXU matmul.

    w_ref: (Cout, 9*Cin) with tap k = (dh+1)*3 + (dw+1) occupying columns [k*Cin, (k+1)*Cin).
    mask_ref: (9, H*W) precomputed boundary masks (same tap order).
    """
    taps = []
    for dh in (-1, 0, 1):
        for dw in (-1, 0, 1):
            k = (dh + 1) * 3 + (dw + 1)
            s = dh * width + dw
            taps.append((s, None if s == 0 else k))   # centre tap needs no mask
    xs = _stack_taps(x, mask_ref, taps)               # (9*Cin, H*W)
    y = jnp.dot(w_ref[...], xs.astype(jnp.bfloat16), preferred_element_type=jnp.float32)
    return act(y + b_ref[...])


# ----------------------------------------------------------------------------
# Fused decoder kernel: one grid step == one batch element, all layers in VMEM
# ----------------------------------------------------------------------------
def _decoder_kernel(z_ref, lwt_ref, lb_ref, u8_ref, u16_ref,
                    wt1_ref, bt1_ref, wc1_ref, bc1_ref,
                    wt2_ref, bt2_ref, wc2_ref, bc2_ref,
                    wp_ref, bp_ref, m8_ref, m16_ref, out_ref):
    bf = jnp.bfloat16
    c1 = wt1_ref.shape[0]                                       # 2 * c_hid

    # ---- nn.Linear(latent_dim, 2*16*c_hid) + GELU ---------------------------
    zb = z_ref[0]                                               # (1, latent)
    h = jnp.dot(zb.astype(bf), lwt_ref[...], preferred_element_type=jnp.float32)
    h = _gelu(h + lb_ref[...])                                  # (1, 16*c1)

    # ---- reshape(B, 2*c_hid, 4, 4): channel c <- lanes [16c, 16c+16) --------
    # A lane->sublane relayout is unavoidable here; it is done with 8 tiny static slices because a
    # general (1,128)->(c1,16) reshape is not guaranteed to lower (only 128 floats involved).
    x = jnp.concatenate([h[:, 16 * c:16 * (c + 1)] for c in range(c1)], axis=0)   # (c1, 16)

    # ---- ConvTranspose2d 4x4 -> 8x8, GELU: zero-dilate (MXU) + 3x3 'same' conv ----
    xd = jnp.dot(x.astype(bf), u8_ref[...], preferred_element_type=jnp.float32)   # (c1, 64)
    x = _conv3x3_same(xd, wt1_ref, bt1_ref, m8_ref, 8, _gelu)
    # ---- Conv2d 3x3 @ 8x8, GELU ----------------------------------------------
    x = _conv3x3_same(x, wc1_ref, bc1_ref, m8_ref, 8, _gelu)
    # ---- ConvTranspose2d 8x8 -> 16x16, GELU -----------------------------------
    xd = jnp.dot(x.astype(bf), u16_ref[...], preferred_element_type=jnp.float32)  # (c1, 256)
    x = _conv3x3_same(xd, wt2_ref, bt2_ref, m16_ref, 16, _gelu)
    # ---- Conv2d 3x3 @ 16x16, GELU ---------------------------------------------
    x = _conv3x3_same(x, wc2_ref, bc2_ref, m16_ref, 16, _gelu)

    # ---- ConvTranspose2d 16x16 -> 32x32 + Tanh, polyphase form -----------------
    # Each output parity plane (pp, qp) only reads the UN-dilated input at lane offsets
    # {0, +1, +16, +17}; all four planes come out of ONE (4*Cout, 4*Cin) matmul.
    taps = ((0, None), (1, 5), (16, 7), (17, 8))      # masks reuse the 16x16 boundary-mask rows
    xs = _stack_taps(x, m16_ref, taps)                # (4*c_hid, 256)
    y = jnp.dot(wp_ref[...], xs.astype(bf), preferred_element_type=jnp.float32)   # (4*c_out, 256)
    out_ref[0] = jnp.tanh(y + bp_ref[...])


_ARG_KEYS = ("lin_wT", "lin_b", "u8", "u16",
             "wt1", "bt1", "wc1", "bc1",
             "wt2", "bt2", "wc2", "bc2",
             "wp", "bp", "mask8", "mask16")


def decoder_forward(z, kp):
    """z: (B, latent_dim) f32.  kp: prepare_params() output.  Returns (B, C_out, 32, 32)."""
    B, latent = z.shape
    c_out = kp["bp"].shape[0] // 4
    args = [kp[k] for k in _ARG_KEYS]

    def full_spec(a):
        return pl.BlockSpec(a.shape, lambda i: (0,) * a.ndim)

    # TODO(synk): for very small B on single-TC chips (v5e/v6e) the batch could be folded into the
    # lane axis (activations (C, B*H*W), masks from lane % (H*W)) to remove per-grid-step overhead;
    # grid=(B,) "parallel" is kept for simplicity and v7x 2-TC occupancy.
    planes = pl.pallas_call(
        _decoder_kernel,
        out_shape=jax.ShapeDtypeStruct((B, 4 * c_out, 16 * 16), jnp.float32),
        grid=(B,),
        in_specs=[pl.BlockSpec((1, 1, latent), lambda i: (i, 0, 0))]
                 + [full_spec(a) for a in args],
        out_specs=pl.BlockSpec((1, 4 * c_out, 16 * 16), lambda i: (i, 0, 0)),
        compiler_params=pltpu.CompilerParams(dimension_semantics=("parallel",)),
    )(z.reshape(B, 1, latent), *args)

    # Pixel-shuffle the 4 parity planes back to NCHW 32x32 (terminal reshape/transpose, XLA-side).
    y = planes.reshape(B, 2, 2, c_out, 16, 16)          # (b, pp, qp, c, po, qo)
    y = jnp.transpose(y, (0, 3, 4, 1, 5, 2))            # (b, c, po, pp, qo, qp)
    return y.reshape(B, c_out, 32, 32)


# ----------------------------------------------------------------------------
# One-time host-side weight transforms (hoisted out of the forward pass)
# ----------------------------------------------------------------------------
def prepare_params(params):
    bf = jnp.bfloat16

    def conv_w(w):            # Conv2d (Cout, Cin, 3, 3) -> (Cout, 9*Cin), tap k = a*3 + b
        cout, cin = w.shape[0], w.shape[1]
        return jnp.transpose(w, (0, 2, 3, 1)).reshape(cout, 9 * cin).astype(bf)

    def convt_w(w):           # ConvTranspose2d (Cin, Cout, 3, 3) -> equivalent 'same'-conv weights
        cin, cout = w.shape[0], w.shape[1]      # on the zero-dilated input, shape (Cout, 9*Cin)
        wf = jnp.flip(w, axis=(2, 3))
        return jnp.transpose(wf, (1, 2, 3, 0)).reshape(cout, 9 * cin).astype(bf)

    def polyphase_w(w):       # ConvTranspose2d (Cin, Cout, 3, 3) -> (4*Cout, 4*Cin) polyphase
        cin, cout = w.shape[0], w.shape[1]      # weights; tap slots t: {0:+0, 1:+1, 2:+W, 3:+W+1}
        w_eq = jnp.transpose(jnp.flip(w, axis=(2, 3)), (2, 3, 1, 0))   # (a, b, Cout, Cin)
        plane_taps = {0: ((0, 1, 1),),                       # (pp,qp)=(0,0)
                      1: ((0, 1, 0), (1, 1, 2)),             # (0,1)
                      2: ((0, 0, 1), (2, 2, 1)),             # (1,0)
                      3: ((0, 0, 0), (1, 0, 2), (2, 2, 0), (3, 2, 2))}  # (1,1)
        wp = jnp.zeros((4 * cout, 4 * cin), jnp.float32)
        for pi, taps in plane_taps.items():
            for t, a, b in taps:
                wp = wp.at[pi * cout:(pi + 1) * cout, t * cin:(t + 1) * cin].set(w_eq[a, b])
        return wp.astype(bf)

    def dilation_matrix(h, w):
        # (h*w, 4*h*w) 0/1 matrix U: (x @ U) places x[i, j] at (2i, 2j) of a zero-filled (2h, 2w)
        # map (row-major), i.e. the stride-2 zero-dilation used by ConvTranspose2d.  Exact in bf16.
        m = jnp.arange(h * w)
        i, j = m // w, m % w
        n = (2 * i) * (2 * w) + 2 * j
        return jnp.zeros((h * w, 4 * h * w), jnp.float32).at[m, n].set(1.0).astype(bf)

    def boundary_masks(h, w):
        m = jnp.arange(h * w)
        row, col = m // w, m % w
        rows = []
        for dh in (-1, 0, 1):
            for dw in (-1, 0, 1):
                ok = ((row + dh >= 0) & (row + dh <= h - 1)
                      & (col + dw >= 0) & (col + dw <= w - 1))
                rows.append(ok.astype(jnp.float32))
        return jnp.stack(rows, axis=0)          # (9, h*w)

    return {
        "lin_wT": params["lin_w"].T.astype(bf),
        "lin_b": params["lin_b"].reshape(1, -1),
        "u8": dilation_matrix(4, 4),
        "u16": dilation_matrix(8, 8),
        "wt1": convt_w(params["ct1_w"]), "bt1": params["ct1_b"].reshape(-1, 1),
        "wc1": conv_w(params["c1_w"]), "bc1": params["c1_b"].reshape(-1, 1),
        "wt2": convt_w(params["ct2_w"]), "bt2": params["ct2_b"].reshape(-1, 1),
        "wc2": conv_w(params["c2_w"]), "bc2": params["c2_b"].reshape(-1, 1),
        "wp": polyphase_w(params["ct3_w"]),
        "bp": jnp.tile(params["ct3_b"].reshape(-1, 1), (4, 1)),
        "mask8": boundary_masks(8, 8),
        "mask16": boundary_masks(16, 16),
    }


# ----------------------------------------------------------------------------
# Deterministic parameter init (shapes match the PyTorch module)
# ----------------------------------------------------------------------------
def init_params(key, num_input_channels, c_hid, latent_dim):
    ks = jax.random.split(key, 12)

    def w(k, shape, fan_in):
        return jax.random.normal(k, shape, jnp.float32) / jnp.sqrt(float(fan_in))

    p = {}
    p["lin_w"] = w(ks[0], (2 * 16 * c_hid, latent_dim), latent_dim)       # nn.Linear
    p["lin_b"] = w(ks[1], (2 * 16 * c_hid,), latent_dim)
    p["ct1_w"] = w(ks[2], (2 * c_hid, 2 * c_hid, 3, 3), 9 * 2 * c_hid)    # ConvTranspose2d
    p["ct1_b"] = w(ks[3], (2 * c_hid,), 9 * 2 * c_hid)
    p["c1_w"] = w(ks[4], (2 * c_hid, 2 * c_hid, 3, 3), 9 * 2 * c_hid)     # Conv2d
    p["c1_b"] = w(ks[5], (2 * c_hid,), 9 * 2 * c_hid)
    p["ct2_w"] = w(ks[6], (2 * c_hid, c_hid, 3, 3), 9 * 2 * c_hid)        # ConvTranspose2d
    p["ct2_b"] = w(ks[7], (c_hid,), 9 * 2 * c_hid)
    p["c2_w"] = w(ks[8], (c_hid, c_hid, 3, 3), 9 * c_hid)                 # Conv2d
    p["c2_b"] = w(ks[9], (c_hid,), 9 * c_hid)
    p["ct3_w"] = w(ks[10], (c_hid, num_input_channels, 3, 3), 9 * c_hid)  # ConvTranspose2d
    p["ct3_b"] = w(ks[11], (num_input_channels,), 9 * c_hid)
    return p


# ----------------------------------------------------------------------------
# Pure-JAX reference (lax convs).  matmul_dtype=bf16 reproduces the kernel's MXU operand
# rounding exactly (structural check); matmul_dtype=f32 is the full-precision reference.
# ----------------------------------------------------------------------------
def decoder_reference(z, params, c_hid, matmul_dtype=jnp.float32):
    dn = ("NHWC", "HWIO", "NHWC")
    hp = lax.Precision.HIGHEST
    md = matmul_dtype

    def convt(x, w, b):
        w_eq = jnp.transpose(jnp.flip(w, (2, 3)), (2, 3, 0, 1))
        y = lax.conv_general_dilated(x.astype(md), w_eq.astype(md), (1, 1), ((1, 2), (1, 2)),
                                     lhs_dilation=(2, 2), dimension_numbers=dn,
                                     precision=hp, preferred_element_type=jnp.float32)
        return y + b

    def conv(x, w, b):
        w_eq = jnp.transpose(w, (2, 3, 1, 0))
        y = lax.conv_general_dilated(x.astype(md), w_eq.astype(md), (1, 1), ((1, 1), (1, 1)),
                                     dimension_numbers=dn, precision=hp,
                                     preferred_element_type=jnp.float32)
        return y + b

    h = jnp.dot(z.astype(md), params["lin_w"].T.astype(md), precision=hp,
                preferred_element_type=jnp.float32)
    h = _gelu(h + params["lin_b"])
    x = h.reshape(z.shape[0], 2 * c_hid, 4, 4).transpose(0, 2, 3, 1)
    x = _gelu(convt(x, params["ct1_w"], params["ct1_b"]))
    x = _gelu(conv(x, params["c1_w"], params["c1_b"]))
    x = _gelu(convt(x, params["ct2_w"], params["ct2_b"]))
    x = _gelu(conv(x, params["c2_w"], params["c2_b"]))
    x = jnp.tanh(convt(x, params["ct3_w"], params["ct3_b"]))
    return x.transpose(0, 3, 1, 2)


if __name__ == "__main__":
    B, num_input_channels, c_hid, latent_dim = 2, 3, 4, 32
    key = jax.random.PRNGKey(0)
    kz, kparams = jax.random.split(key)
    z = jax.random.normal(kz, (B, latent_dim), jnp.float32)
    params = init_params(kparams, num_input_channels, c_hid, latent_dim)

    _detect_lane_roll()                   # pick pltpu.roll vs slice+concat lane shifts
    kp = prepare_params(params)           # one-time host-side weight transforms

    fwd = jax.jit(decoder_forward)
    out = jax.block_until_ready(fwd(z, kp))
    assert out.shape == (B, num_input_channels, 32, 32), out.shape

    # Structural check: a reference applying the same bf16 rounding to every matmul operand
    # (as the kernel's MXU path does) must agree tightly.
    ref_bf16 = decoder_reference(z, params, c_hid, matmul_dtype=jnp.bfloat16)
    err_struct = float(jnp.max(jnp.abs(out - ref_bf16)))
    assert err_struct < 1e-2, f"structural max abs diff vs bf16-matmul reference: {err_struct}"

    # Precision sanity vs the full-f32 reference (bf16 MXU operands => looser bound).
    ref_f32 = decoder_reference(z, params, c_hid, matmul_dtype=jnp.float32)
    err_f32 = float(jnp.max(jnp.abs(out - ref_f32)))
    assert err_f32 < 1e-1, f"max abs diff vs f32 reference: {err_f32}"

    print("KERNEL_OK")
</pallas_src>

<mosaic_0001>
module attributes {stable_mosaic.version = 11 : i64} {
  func.func @_roll_probe_kernel(%arg0: memref<4x256xf32, #tpu.memory_space<vmem>>, %arg1: memref<4x256xf32, #tpu.memory_space<vmem>>) attributes {dimension_semantics = [], scalar_prefetch = 0 : i64, scratch_operands = 0 : i64, tpu.core_type = #tpu.core_type<tc>} {
    %c0 = arith.constant 0 : index
    %c0_0 = arith.constant 0 : index
    %0 = vector.load %arg0[%c0, %c0_0] : memref<4x256xf32, #tpu.memory_space<vmem>>, vector<4x256xf32>
    %c240_i32 = arith.constant 240 : i32
    %1 = tpu.dynamic_rotate %0 by %c240_i32 dim 1 : vector<4x256xf32>, i32 -> vector<4x256xf32>
    %c0_1 = arith.constant 0 : index
    %c0_2 = arith.constant 0 : index
    %2 = vector.load %arg1[%c0_1, %c0_2] : memref<4x256xf32, #tpu.memory_space<vmem>>, vector<4x256xf32>
    tpu.vector_store %arg1[%c0_1, %c0_2], %1 {strides = array<i32>} : memref<4x256xf32, #tpu.memory_space<vmem>>, vector<4x256xf32>,
    return
  }
}

module attributes {stable_mosaic.version = 11 : i64} {
  func.func @_decoder_kernel(%arg0: i32, %arg1: memref<1x1x32xf32, #tpu.memory_space<vmem>>, %arg2: memref<32x128xbf16, #tpu.memory_space<vmem>>, %arg3: memref<1x128xf32, #tpu.memory_space<vmem>>, %arg4: memref<16x64xbf16, #tpu.memory_space<vmem>>, %arg5: memref<64x256xbf16, #tpu.memory_space<vmem>>, %arg6: memref<8x72xbf16, #tpu.memory_space<vmem>>, %arg7: memref<8x1xf32, #tpu.memory_space<vmem>>, %arg8: memref<8x72xbf16, #tpu.memory_space<vmem>>, %arg9: memref<8x1xf32, #tpu.memory_space<vmem>>, %arg10: memref<4x72xbf16, #tpu.memory_space<vmem>>, %arg11: memref<4x1xf32, #tpu.memory_space<vmem>>, %arg12: memref<4x36xbf16, #tpu.memory_space<vmem>>, %arg13: memref<4x1xf32, #tpu.memory_space<vmem>>, %arg14: memref<12x16xbf16, #tpu.memory_space<vmem>>, %arg15: memref<12x1xf32, #tpu.memory_space<vmem>>, %arg16: memref<9x64xf32, #tpu.memory_space<vmem>>, %arg17: memref<9x256xf32, #tpu.memory_space<vmem>>, %arg18: memref<1x12x256xf32, #tpu.memory_space<vmem>>) attributes {dimension_semantics = [#tpu.dimension_semantics<parallel>], iteration_bounds = array<i64: 2>, scalar_prefetch = 0 : i64, scratch_operands = 0 : i64, tpu.core_type = #tpu.core_type<tc>, window_params = [{transform_indices = @transform_0, window_bounds = array<i64: 1, 1, 32>}, {pipeline_mode = #tpu.pipeline_mode<synchronous>, transform_indices = @transform_1, window_bounds = array<i64: 32, 128>}, {pipeline_mode = #tpu.pipeline_mode<synchronous>, transform_indices = @transform_2, window_bounds = array<i64: 1, 128>}, {pipeline_mode = #tpu.pipeline_mode<synchronous>, transform_indices = @transform_3, window_bounds = array<i64: 16, 64>}, {pipeline_mode = #tpu.pipeline_mode<synchronous>, transform_indices = @transform_4, window_bounds = array<i64: 64, 256>}, {pipeline_mode = #tpu.pipeline_mode<synchronous>, transform_indices = @transform_5, window_bounds = array<i64: 8, 72>}, {pipeline_mode = #tpu.pipeline_mode<synchronous>, transform_indices = @transform_6, window_bounds = array<i64: 8, 1>}, {pipeline_mode = #tpu.pipeline_mode<synchronous>, transform_indices = @transform_7, window_bounds = array<i64: 8, 72>}, {pipeline_mode = #tpu.pipeline_mode<synchronous>, transform_indices = @transform_8, window_bounds = array<i64: 8, 1>}, {pipeline_mode = #tpu.pipeline_mode<synchronous>, transform_indices = @transform_9, window_bounds = array<i64: 4, 72>}, {pipeline_mode = #tpu.pipeline_mode<synchronous>, transform_indices = @transform_10, window_bounds = array<i64: 4, 1>}, {pipeline_mode = #tpu.pipeline_mode<synchronous>, transform_indices = @transform_11, window_bounds = array<i64: 4, 36>}, {pipeline_mode = #tpu.pipeline_mode<synchronous>, transform_indices = @transform_12, window_bounds = array<i64: 4, 1>}, {pipeline_mode = #tpu.pipeline_mode<synchronous>, transform_indices = @transform_13, window_bounds = array<i64: 12, 16>}, {pipeline_mode = #tpu.pipeline_mode<synchronous>, transform_indices = @transform_14, window_bounds = array<i64: 12, 1>}, {pipeline_mode = #tpu.pipeline_mode<synchronous>, transform_indices = @transform_15, window_bounds = array<i64: 9, 64>}, {pipeline_mode = #tpu.pipeline_mode<synchronous>, transform_indices = @transform_16, window_bounds = array<i64: 9, 256>}, {transform_indices = @transform_17, window_bounds = array<i64: 1, 12, 256>}]} {
    %c0 = arith.constant 0 : index
    %c0_0 = arith.constant 0 : index
    %c0_1 = arith.constant 0 : index
    %0 = vector.load %arg1[%c0, %c0_0, %c0_1] : memref<1x1x32xf32, #tpu.memory_space<vmem>>, vector<1x1x32xf32>
    %1 = vector.shape_cast %0 : vector<1x1x32xf32> to vector<1x32xf32>
    %2 = arith.truncf %1 : vector<1x32xf32> to vector<1x32xbf16>
    %c0_2 = arith.constant 0 : index
    %c0_3 = arith.constant 0 : index
    %3 = vector.load %arg2[%c0_2, %c0_3] : memref<32x128xbf16, #tpu.memory_space<vmem>>, vector<32x128xbf16>
    %cst = arith.constant dense<0.000000e+00> : vector<1x128xf32>
    %4 = tpu.matmul %2, %3, %cst {dimension_numbers = #tpu.dot_dimension_numbers<[1], [0], [0], [1], [0, 0, 1, 1], [], []>} : vector<1x32xbf16>, vector<32x128xbf16>, vector<1x128xf32> -> vector<1x128xf32>
    %c0_4 = arith.constant 0 : index
    %c0_5 = arith.constant 0 : index
    %5 = vector.load %arg3[%c0_4, %c0_5] : memref<1x128xf32, #tpu.memory_space<vmem>>, vector<1x128xf32>
    %6 = arith.addf %4, %5 : vector<1x128xf32>
    %cst_6 = arith.constant 5.000000e-01 : f32
    %7 = vector.broadcast %cst_6 : f32 to vector<1x128xf32>
    %8 = arith.mulf %7, %6 : vector<1x128xf32>
    %cst_7 = arith.constant 4.471500e-02 : f32
    %9 = vector.broadcast %cst_7 : f32 to vector<1x128xf32>
    %10 = arith.mulf %9, %6 : vector<1x128xf32>
    %11 = arith.mulf %10, %6 : vector<1x128xf32>
    %12 = arith.mulf %11, %6 : vector<1x128xf32>
    %13 = arith.addf %6, %12 : vector<1x128xf32>
    %cst_8 = arith.constant 0.797884583 : f32
    %14 = vector.broadcast %cst_8 : f32 to vector<1x128xf32>
    %15 = arith.mulf %14, %13 : vector<1x128xf32>
    %16 = math.tanh %15 : vector<1x128xf32>
    %cst_9 = arith.constant 1.000000e+00 : f32
    %17 = vector.broadcast %cst_9 : f32 to vector<1x128xf32>
    %18 = arith.addf %17, %16 : vector<1x128xf32>
    %19 = arith.mulf %8, %18 : vector<1x128xf32>
    %20 = vector.extract_strided_slice %19 {offsets = [0, 0], sizes = [1, 16], strides = [1, 1]} : vector<1x128xf32> to vector<1x16xf32>
    %21 = vector.extract_strided_slice %19 {offsets = [0, 16], sizes = [1, 16], strides = [1, 1]} : vector<1x128xf32> to vector<1x16xf32>
    %22 = vector.extract_strided_slice %19 {offsets = [0, 32], sizes = [1, 16], strides = [1, 1]} : vector<1x128xf32> to vector<1x16xf32>
    %23 = vector.extract_strided_slice %19 {offsets = [0, 48], sizes = [1, 16], strides = [1, 1]} : vector<1x128xf32> to vector<1x16xf32>
    %24 = vector.extract_strided_slice %19 {offsets = [0, 64], sizes = [1, 16], strides = [1, 1]} : vector<1x128xf32> to vector<1x16xf32>
    %25 = vector.extract_strided_slice %19 {offsets = [0, 80], sizes = [1, 16], strides = [1, 1]} : vector<1x128xf32> to vector<1x16xf32>
    %26 = vector.extract_strided_slice %19 {offsets = [0, 96], sizes = [1, 16], strides = [1, 1]} : vector<1x128xf32> to vector<1x16xf32>
    %27 = vector.extract_strided_slice %19 {offsets = [0, 112], sizes = [1, 16], strides = [1, 1]} : vector<1x128xf32> to vector<1x16xf32>
    %28 = tpu.concatenate %20, %21, %22, %23, %24, %25, %26, %27 in 0 : vector<1x16xf32>, vector<1x16xf32>, vector<1x16xf32>, vector<1x16xf32>, vector<1x16xf32>, vector<1x16xf32>, vector<1x16xf32>, vector<1x16xf32> -> vector<8x16xf32>
    %29 = arith.truncf %28 : vector<8x16xf32> to vector<8x16xbf16>
    %c0_10 = arith.constant 0 : index
    %c0_11 = arith.constant 0 : index
    %30 = vector.load %arg4[%c0_10, %c0_11] : memref<16x64xbf16, #tpu.memory_space<vmem>>, vector<16x64xbf16>
    %cst_12 = arith.constant dense<0.000000e+00> : vector<8x64xf32>
    %31 = tpu.matmul %29, %30, %cst_12 {dimension_numbers = #tpu.dot_dimension_numbers<[1], [0], [0], [1], [0, 0, 1, 1], [], []>} : vector<8x16xbf16>, vector<16x64xbf16>, vector<8x64xf32> -> vector<8x64xf32>
    %32 = vector.extract_strided_slice %31 {offsets = [0, 55], sizes = [8, 9], strides = [1, 1]} : vector<8x64xf32> to vector<8x9xf32>
    %33 = vector.extract_strided_slice %31 {offsets = [0, 0], sizes = [8, 55], strides = [1, 1]} : vector<8x64xf32> to vector<8x55xf32>
    %34 = tpu.concatenate %32, %33 in 1 : vector<8x9xf32>, vector<8x55xf32> -> vector<8x64xf32>
    %c0_13 = arith.constant 0 : index
    %c0_14 = arith.constant 0 : index
    %35 = vector.load %arg16[%c0_13, %c0_14] : memref<9x64xf32, #tpu.memory_space<vmem>>, vector<1x64xf32>
    %36 = vector.broadcast %35 : vector<1x64xf32> to vector<8x64xf32>
    %37 = arith.mulf %34, %36 : vector<8x64xf32>
    %38 = vector.extract_strided_slice %31 {offsets = [0, 56], sizes = [8, 8], strides = [1, 1]} : vector<8x64xf32> to vector<8x8xf32>
    %39 = vector.extract_strided_slice %31 {offsets = [0, 0], sizes = [8, 56], strides = [1, 1]} : vector<8x64xf32> to vector<8x56xf32>
    %40 = tpu.concatenate %38, %39 in 1 : vector<8x8xf32>, vector<8x56xf32> -> vector<8x64xf32>
    %c1 = arith.constant 1 : index
    %c0_15 = arith.constant 0 : index
    %41 = vector.load %arg16[%c1, %c0_15] : memref<9x64xf32, #tpu.memory_space<vmem>>, vector<1x64xf32>
    %42 = vector.broadcast %41 : vector<1x64xf32> to vector<8x64xf32>
    %43 = arith.mulf %40, %42 : vector<8x64xf32>
    %44 = vector.extract_strided_slice %31 {offsets = [0, 57], sizes = [8, 7], strides = [1, 1]} : vector<8x64xf32> to vector<8x7xf32>
    %45 = vector.extract_strided_slice %31 {offsets = [0, 0], sizes = [8, 57], strides = [1, 1]} : vector<8x64xf32> to vector<8x57xf32>
    %46 = tpu.concatenate %44, %45 in 1 : vector<8x7xf32>, vector<8x57xf32> -> vector<8x64xf32>
    %c2 = arith.constant 2 : index
    %c0_16 = arith.constant 0 : index
    %47 = vector.load %arg16[%c2, %c0_16] : memref<9x64xf32, #tpu.memory_space<vmem>>, vector<1x64xf32>
    %48 = vector.broadcast %47 : vector<1x64xf32> to vector<8x64xf32>
    %49 = arith.mulf %46, %48 : vector<8x64xf32>
    %50 = vector.extract_strided_slice %31 {offsets = [0, 63], sizes = [8, 1], strides = [1, 1]} : vector<8x64xf32> to vector<8x1xf32>
    %51 = vector.extract_strided_slice %31 {offsets = [0, 0], sizes = [8, 63], strides = [1, 1]} : vector<8x64xf32> to vector<8x63xf32>
    %52 = tpu.concatenate %50, %51 in 1 : vector<8x1xf32>, vector<8x63xf32> -> vector<8x64xf32>
    %c3 = arith.constant 3 : index
    %c0_17 = arith.constant 0 : index
    %53 = vector.load %arg16[%c3, %c0_17] : memref<9x64xf32, #tpu.memory_space<vmem>>, vector<1x64xf32>
    %54 = vector.broadcast %53 : vector<1x64xf32> to vector<8x64xf32>
    %55 = arith.mulf %52, %54 : vector<8x64xf32>
    %56 = vector.extract_strided_slice %31 {offsets = [0, 1], sizes = [8, 63], strides = [1, 1]} : vector<8x64xf32> to vector<8x63xf32>
    %57 = vector.extract_strided_slice %31 {offsets = [0, 0], sizes = [8, 1], strides = [1, 1]} : vector<8x64xf32> to vector<8x1xf32>
    %58 = tpu.concatenate %56, %57 in 1 : vector<8x63xf32>, vector<8x1xf32> -> vector<8x64xf32>
    %c5 = arith.constant 5 : index
    %c0_18 = arith.constant 0 : index
    %59 = vector.load %arg16[%c5, %c0_18] : memref<9x64xf32, #tpu.memory_space<vmem>>, vector<1x64xf32>
    %60 = vector.broadcast %59 : vector<1x64xf32> to vector<8x64xf32>
    %61 = arith.mulf %58, %60 : vector<8x64xf32>
    %62 = vector.extract_strided_slice %31 {offsets = [0, 7], sizes = [8, 57], strides = [1, 1]} : vector<8x64xf32> to vector<8x57xf32>
    %63 = vector.extract_strided_slice %31 {offsets = [0, 0], sizes = [8, 7], strides = [1, 1]} : vector<8x64xf32> to vector<8x7xf32>
    %64 = tpu.concatenate %62, %63 in 1 : vector<8x57xf32>, vector<8x7xf32> -> vector<8x64xf32>
    %c6 = arith.constant 6 : index
    %c0_19 = arith.constant 0 : index
    %65 = vector.load %arg16[%c6, %c0_19] : memref<9x64xf32, #tpu.memory_space<vmem>>, vector<1x64xf32>
    %66 = vector.broadcast %65 : vector<1x64xf32> to vector<8x64xf32>
    %67 = arith.mulf %64, %66 : vector<8x64xf32>
    %68 = vector.extract_strided_slice %31 {offsets = [0, 8], sizes = [8, 56], strides = [1, 1]} : vector<8x64xf32> to vector<8x56xf32>
    %69 = vector.extract_strided_slice %31 {offsets = [0, 0], sizes = [8, 8], strides = [1, 1]} : vector<8x64xf32> to vector<8x8xf32>
    %70 = tpu.concatenate %68, %69 in 1 : vector<8x56xf32>, vector<8x8xf32> -> vector<8x64xf32>
    %c7 = arith.constant 7 : index
    %c0_20 = arith.constant 0 : index
    %71 = vector.load %arg16[%c7, %c0_20] : memref<9x64xf32, #tpu.memory_space<vmem>>, vector<1x64xf32>
    %72 = vector.broadcast %71 : vector<1x64xf32> to vector<8x64xf32>
    %73 = arith.mulf %70, %72 : vector<8x64xf32>
    %74 = vector.extract_strided_slice %31 {offsets = [0, 9], sizes = [8, 55], strides = [1, 1]} : vector<8x64xf32> to vector<8x55xf32>
    %75 = vector.extract_strided_slice %31 {offsets = [0, 0], sizes = [8, 9], strides = [1, 1]} : vector<8x64xf32> to vector<8x9xf32>
    %76 = tpu.concatenate %74, %75 in 1 : vector<8x55xf32>, vector<8x9xf32> -> vector<8x64xf32>
    %c8 = arith.constant 8 : index
    %c0_21 = arith.constant 0 : index
    %77 = vector.load %arg16[%c8, %c0_21] : memref<9x64xf32, #tpu.memory_space<vmem>>, vector<1x64xf32>
    %78 = vector.broadcast %77 : vector<1x64xf32> to vector<8x64xf32>
    %79 = arith.mulf %76, %78 : vector<8x64xf32>
    %80 = tpu.concatenate %37, %43, %49, %55, %31, %61, %67, %73, %79 in 0 : vector<8x64xf32>, vector<8x64xf32>, vector<8x64xf32>, vector<8x64xf32>, vector<8x64xf32>, vector<8x64xf32>, vector<8x64xf32>, vector<8x64xf32>, vector<8x64xf32> -> vector<72x64xf32>
    %c0_22 = arith.constant 0 : index
    %c0_23 = arith.constant 0 : index
    %81 = vector.load %arg6[%c0_22, %c0_23] : memref<8x72xbf16, #tpu.memory_space<vmem>>, vector<8x72xbf16>
    %82 = arith.truncf %80 : vector<72x64xf32> to vector<72x64xbf16>
    %cst_24 = arith.constant dense<0.000000e+00> : vector<8x64xf32>
    %83 = tpu.matmul %81, %82, %cst_24 {dimension_numbers = #tpu.dot_dimension_numbers<[1], [0], [0], [1], [0, 0, 1, 1], [], []>} : vector<8x72xbf16>, vector<72x64xbf16>, vector<8x64xf32> -> vector<8x64xf32>
    %c0_25 = arith.constant 0 : index
    %c0_26 = arith.constant 0 : index
    %84 = vector.load %arg7[%c0_25, %c0_26] : memref<8x1xf32, #tpu.memory_space<vmem>>, vector<8x1xf32>
    %85 = vector.broadcast %84 : vector<8x1xf32> to vector<8x64xf32>
    %86 = arith.addf %83, %85 : vector<8x64xf32>
    %cst_27 = arith.constant 5.000000e-01 : f32
    %87 = vector.broadcast %cst_27 : f32 to vector<8x64xf32>
    %88 = arith.mulf %87, %86 : vector<8x64xf32>
    %cst_28 = arith.constant 4.471500e-02 : f32
    %89 = vector.broadcast %cst_28 : f32 to vector<8x64xf32>
    %90 = arith.mulf %89, %86 : vector<8x64xf32>
    %91 = arith.mulf %90, %86 : vector<8x64xf32>
    %92 = arith.mulf %91, %86 : vector<8x64xf32>
    %93 = arith.addf %86, %92 : vector<8x64xf32>
    %cst_29 = arith.constant 0.797884583 : f32
    %94 = vector.broadcast %cst_29 : f32 to vector<8x64xf32>
    %95 = arith.mulf %94, %93 : vector<8x64xf32>
    %96 = math.tanh %95 : vector<8x64xf32>
    %cst_30 = arith.constant 1.000000e+00 : f32
    %97 = vector.broadcast %cst_30 : f32 to vector<8x64xf32>
    %98 = arith.addf %97, %96 : vector<8x64xf32>
    %99 = arith.mulf %88, %98 : vector<8x64xf32>
    %100 = vector.extract_strided_slice %99 {offsets = [0, 55], sizes = [8, 9], strides = [1, 1]} : vector<8x64xf32> to vector<8x9xf32>
    %101 = vector.extract_strided_slice %99 {offsets = [0, 0], sizes = [8, 55], strides = [1, 1]} : vector<8x64xf32> to vector<8x55xf32>
    %102 = tpu.concatenate %100, %101 in 1 : vector<8x9xf32>, vector<8x55xf32> -> vector<8x64xf32>
    %c0_31 = arith.constant 0 : index
    %c0_32 = arith.constant 0 : index
    %103 = vector.load %arg16[%c0_31, %c0_32] : memref<9x64xf32, #tpu.memory_space<vmem>>, vector<1x64xf32>
    %104 = vector.broadcast %103 : vector<1x64xf32> to vector<8x64xf32>
    %105 = arith.mulf %102, %104 : vector<8x64xf32>
    %106 = vector.extract_strided_slice %99 {offsets = [0, 56], sizes = [8, 8], strides = [1, 1]} : vector<8x64xf32> to vector<8x8xf32>
    %107 = vector.extract_strided_slice %99 {offsets = [0, 0], sizes = [8, 56], strides = [1, 1]} : vector<8x64xf32> to vector<8x56xf32>
    %108 = tpu.concatenate %106, %107 in 1 : vector<8x8xf32>, vector<8x56xf32> -> vector<8x64xf32>
    %c1_33 = arith.constant 1 : index
    %c0_34 = arith.constant 0 : index
    %109 = vector.load %arg16[%c1_33, %c0_34] : memref<9x64xf32, #tpu.memory_space<vmem>>, vector<1x64xf32>
    %110 = vector.broadcast %109 : vector<1x64xf32> to vector<8x64xf32>
    %111 = arith.mulf %108, %110 : vector<8x64xf32>
    %112 = vector.extract_strided_slice %99 {offsets = [0, 57], sizes = [8, 7], strides = [1, 1]} : vector<8x64xf32> to vector<8x7xf32>
    %113 = vector.extract_strided_slice %99 {offsets = [0, 0], sizes = [8, 57], strides = [1, 1]} : vector<8x64xf32> to vector<8x57xf32>
    %114 = tpu.concatenate %112, %113 in 1 : vector<8x7xf32>, vector<8x57xf32> -> vector<8x64xf32>
    %c2_35 = arith.constant 2 : index
    %c0_36 = arith.constant 0 : index
    %115 = vector.load %arg16[%c2_35, %c0_36] : memref<9x64xf32, #tpu.memory_space<vmem>>, vector<1x64xf32>
    %116 = vector.broadcast %115 : vector<1x64xf32> to vector<8x64xf32>
    %117 = arith.mulf %114, %116 : vector<8x64xf32>
    %118 = vector.extract_strided_slice %99 {offsets = [0, 63], sizes = [8, 1], strides = [1, 1]} : vector<8x64xf32> to vector<8x1xf32>
    %119 = vector.extract_strided_slice %99 {offsets = [0, 0], sizes = [8, 63], strides = [1, 1]} : vector<8x64xf32> to vector<8x63xf32>
    %120 = tpu.concatenate %118, %119 in 1 : vector<8x1xf32>, vector<8x63xf32> -> vector<8x64xf32>
    %c3_37 = arith.constant 3 : index
    %c0_38 = arith.constant 0 : index
    %121 = vector.load %arg16[%c3_37, %c0_38] : memref<9x64xf32, #tpu.memory_space<vmem>>, vector<1x64xf32>
    %122 = vector.broadcast %121 : vector<1x64xf32> to vector<8x64xf32>
    %123 = arith.mulf %120, %122 : vector<8x64xf32>
    %124 = vector.extract_strided_slice %99 {offsets = [0, 1], sizes = [8, 63], strides = [1, 1]} : vector<8x64xf32> to vector<8x63xf32>
    %125 = vector.extract_strided_slice %99 {offsets = [0, 0], sizes = [8, 1], strides = [1, 1]} : vector<8x64xf32> to vector<8x1xf32>
    %126 = tpu.concatenate %124, %125 in 1 : vector<8x63xf32>, vector<8x1xf32> -> vector<8x64xf32>
    %c5_39 = arith.constant 5 : index
    %c0_40 = arith.constant 0 : index
    %127 = vector.load %arg16[%c5_39, %c0_40] : memref<9x64xf32, #tpu.memory_space<vmem>>, vector<1x64xf32>
    %128 = vector.broadcast %127 : vector<1x64xf32> to vector<8x64xf32>
    %129 = arith.mulf %126, %128 : vector<8x64xf32>
    %130 = vector.extract_strided_slice %99 {offsets = [0, 7], sizes = [8, 57], strides = [1, 1]} : vector<8x64xf32> to vector<8x57xf32>
    %131 = vector.extract_strided_slice %99 {offsets = [0, 0], sizes = [8, 7], strides = [1, 1]} : vector<8x64xf32> to vector<8x7xf32>
    %132 = tpu.concatenate %130, %131 in 1 : vector<8x57xf32>, vector<8x7xf32> -> vector<8x64xf32>
    %c6_41 = arith.constant 6 : index
    %c0_42 = arith.constant 0 : index
    %133 = vector.load %arg16[%c6_41, %c0_42] : memref<9x64xf32, #tpu.memory_space<vmem>>, vector<1x64xf32>
    %134 = vector.broadcast %133 : vector<1x64xf32> to vector<8x64xf32>
    %135 = arith.mulf %132, %134 : vector<8x64xf32>
    %136 = vector.extract_strided_slice %99 {offsets = [0, 8], sizes = [8, 56], strides = [1, 1]} : vector<8x64xf32> to vector<8x56xf32>
    %137 = vector.extract_strided_slice %99 {offsets = [0, 0], sizes = [8, 8], strides = [1, 1]} : vector<8x64xf32> to vector<8x8xf32>
    %138 = tpu.concatenate %136, %137 in 1 : vector<8x56xf32>, vector<8x8xf32> -> vector<8x64xf32>
    %c7_43 = arith.constant 7 : index
    %c0_44 = arith.constant 0 : index
    %139 = vector.load %arg16[%c7_43, %c0_44] : memref<9x64xf32, #tpu.memory_space<vmem>>, vector<1x64xf32>
    %140 = vector.broadcast %139 : vector<1x64xf32> to vector<8x64xf32>
    %141 = arith.mulf %138, %140 : vector<8x64xf32>
    %142 = vector.extract_strided_slice %99 {offsets = [0, 9], sizes = [8, 55], strides = [1, 1]} : vector<8x64xf32> to vector<8x55xf32>
    %143 = vector.extract_strided_slice %99 {offsets = [0, 0], sizes = [8, 9], strides = [1, 1]} : vector<8x64xf32> to vector<8x9xf32>
    %144 = tpu.concatenate %142, %143 in 1 : vector<8x55xf32>, vector<8x9xf32> -> vector<8x64xf32>
    %c8_45 = arith.constant 8 : index
    %c0_46 = arith.constant 0 : index
    %145 = vector.load %arg16[%c8_45, %c0_46] : memref<9x64xf32, #tpu.memory_space<vmem>>, vector<1x64xf32>
    %146 = vector.broadcast %145 : vector<1x64xf32> to vector<8x64xf32>
    %147 = arith.mulf %144, %146 : vector<8x64xf32>
    %148 = tpu.concatenate %105, %111, %117, %123, %99, %129, %135, %141, %147 in 0 : vector<8x64xf32>, vector<8x64xf32>, vector<8x64xf32>, vector<8x64xf32>, vector<8x64xf32>, vector<8x64xf32>, vector<8x64xf32>, vector<8x64xf32>, vector<8x64xf32> -> vector<72x64xf32>
    %c0_47 = arith.constant 0 : index
    %c0_48 = arith.constant 0 : index
    %149 = vector.load %arg8[%c0_47, %c0_48] : memref<8x72xbf16, #tpu.memory_space<vmem>>, vector<8x72xbf16>
    %150 = arith.truncf %148 : vector<72x64xf32> to vector<72x64xbf16>
    %cst_49 = arith.constant dense<0.000000e+00> : vector<8x64xf32>
    %151 = tpu.matmul %149, %150, %cst_49 {dimension_numbers = #tpu.dot_dimension_numbers<[1], [0], [0], [1], [0, 0, 1, 1], [], []>} : vector<8x72xbf16>, vector<72x64xbf16>, vector<8x64xf32> -> vector<8x64xf32>
    %c0_50 = arith.constant 0 : index
    %c0_51 = arith.constant 0 : index
    %152 = vector.load %arg9[%c0_50, %c0_51] : memref<8x1xf32, #tpu.memory_space<vmem>>, vector<8x1xf32>
    %153 = vector.broadcast %152 : vector<8x1xf32> to vector<8x64xf32>
    %154 = arith.addf %151, %153 : vector<8x64xf32>
    %cst_52 = arith.constant 5.000000e-01 : f32
    %155 = vector.broadcast %cst_52 : f32 to vector<8x64xf32>
    %156 = arith.mulf %155, %154 : vector<8x64xf32>
    %cst_53 = arith.constant 4.471500e-02 : f32
    %157 = vector.broadcast %cst_53 : f32 to vector<8x64xf32>
    %158 = arith.mulf %157, %154 : vector<8x64xf32>
    %159 = arith.mulf %158, %154 : vector<8x64xf32>
    %160 = arith.mulf %159, %154 : vector<8x64xf32>
    %161 = arith.addf %154, %160 : vector<8x64xf32>
    %cst_54 = arith.constant 0.797884583 : f32
    %162 = vector.broadcast %cst_54 : f32 to vector<8x64xf32>
    %163 = arith.mulf %162, %161 : vector<8x64xf32>
    %164 = math.tanh %163 : vector<8x64xf32>
    %cst_55 = arith.constant 1.000000e+00 : f32
    %165 = vector.broadcast %cst_55 : f32 to vector<8x64xf32>
    %166 = arith.addf %165, %164 : vector<8x64xf32>
    %167 = arith.mulf %156, %166 : vector<8x64xf32>
    %168 = arith.truncf %167 : vector<8x64xf32> to vector<8x64xbf16>
    %c0_56 = arith.constant 0 : index
    %c0_57 = arith.constant 0 : index
    %169 = vector.load %arg5[%c0_56, %c0_57] : memref<64x256xbf16, #tpu.memory_space<vmem>>, vector<64x256xbf16>
    %cst_58 = arith.constant dense<0.000000e+00> : vector<8x256xf32>
    %170 = tpu.matmul %168, %169, %cst_58 {dimension_numbers = #tpu.dot_dimension_numbers<[1], [0], [0], [1], [0, 0, 1, 1], [], []>} : vector<8x64xbf16>, vector<64x256xbf16>, vector<8x256xf32> -> vector<8x256xf32>
    %171 = vector.extract_strided_slice %170 {offsets = [0, 239], sizes = [8, 17], strides = [1, 1]} : vector<8x256xf32> to vector<8x17xf32>
    %172 = vector.extract_strided_slice %170 {offsets = [0, 0], sizes = [8, 239], strides = [1, 1]} : vector<8x256xf32> to vector<8x239xf32>
    %173 = tpu.concatenate %171, %172 in 1 : vector<8x17xf32>, vector<8x239xf32> -> vector<8x256xf32>
    %c0_59 = arith.constant 0 : index
    %c0_60 = arith.constant 0 : index
    %174 = vector.load %arg17[%c0_59, %c0_60] : memref<9x256xf32, #tpu.memory_space<vmem>>, vector<1x256xf32>
    %175 = vector.broadcast %174 : vector<1x256xf32> to vector<8x256xf32>
    %176 = arith.mulf %173, %175 : vector<8x256xf32>
    %177 = vector.extract_strided_slice %170 {offsets = [0, 240], sizes = [8, 16], strides = [1, 1]} : vector<8x256xf32> to vector<8x16xf32>
    %178 = vector.extract_strided_slice %170 {offsets = [0, 0], sizes = [8, 240], strides = [1, 1]} : vector<8x256xf32> to vector<8x240xf32>
    %179 = tpu.concatenate %177, %178 in 1 : vector<8x16xf32>, vector<8x240xf32> -> vector<8x256xf32>
    %c1_61 = arith.constant 1 : index
    %c0_62 = arith.constant 0 : index
    %180 = vector.load %arg17[%c1_61, %c0_62] : memref<9x256xf32, #tpu.memory_space<vmem>>, vector<1x256xf32>
    %181 = vector.broadcast %180 : vector<1x256xf32> to vector<8x256xf32>
    %182 = arith.mulf %179, %181 : vector<8x256xf32>
    %183 = vector.extract_strided_slice %170 {offsets = [0, 241], sizes = [8, 15], strides = [1, 1]} : vector<8x256xf32> to vector<8x15xf32>
    %184 = vector.extract_strided_slice %170 {offsets = [0, 0], sizes = [8, 241], strides = [1, 1]} : vector<8x256xf32> to vector<8x241xf32>
    %185 = tpu.concatenate %183, %184 in 1 : vector<8x15xf32>, vector<8x241xf32> -> vector<8x256xf32>
    %c2_63 = arith.constant 2 : index
    %c0_64 = arith.constant 0 : index
    %186 = vector.load %arg17[%c2_63, %c0_64] : memref<9x256xf32, #tpu.memory_space<vmem>>, vector<1x256xf32>
    %187 = vector.broadcast %186 : vector<1x256xf32> to vector<8x256xf32>
    %188 = arith.mulf %185, %187 : vector<8x256xf32>
    %189 = vector.extract_strided_slice %170 {offsets = [0, 255], sizes = [8, 1], strides = [1, 1]} : vector<8x256xf32> to vector<8x1xf32>
    %190 = vector.extract_strided_slice %170 {offsets = [0, 0], sizes = [8, 255], strides = [1, 1]} : vector<8x256xf32> to vector<8x255xf32>
    %191 = tpu.concatenate %189, %190 in 1 : vector<8x1xf32>, vector<8x255xf32> -> vector<8x256xf32>
    %c3_65 = arith.constant 3 : index
    %c0_66 = arith.constant 0 : index
    %192 = vector.load %arg17[%c3_65, %c0_66] : memref<9x256xf32, #tpu.memory_space<vmem>>, vector<1x256xf32>
    %193 = vector.broadcast %192 : vector<1x256xf32> to vector<8x256xf32>
    %194 = arith.mulf %191, %193 : vector<8x256xf32>
    %195 = vector.extract_strided_slice %170 {offsets = [0, 1], sizes = [8, 255], strides = [1, 1]} : vector<8x256xf32> to vector<8x255xf32>
    %196 = vector.extract_strided_slice %170 {offsets = [0, 0], sizes = [8, 1], strides = [1, 1]} : vector<8x256xf32> to vector<8x1xf32>
    %197 = tpu.concatenate %195, %196 in 1 : vector<8x255xf32>, vector<8x1xf32> -> vector<8x256xf32>
    %c5_67 = arith.constant 5 : index
    %c0_68 = arith.constant 0 : index
    %198 = vector.load %arg17[%c5_67, %c0_68] : memref<9x256xf32, #tpu.memory_space<vmem>>, vector<1x256xf32>
    %199 = vector.broadcast %198 : vector<1x256xf32> to vector<8x256xf32>
    %200 = arith.mulf %197, %199 : vector<8x256xf32>
    %201 = vector.extract_strided_slice %170 {offsets = [0, 15], sizes = [8, 241], strides = [1, 1]} : vector<8x256xf32> to vector<8x241xf32>
    %202 = vector.extract_strided_slice %170 {offsets = [0, 0], sizes = [8, 15], strides = [1, 1]} : vector<8x256xf32> to vector<8x15xf32>
    %203 = tpu.concatenate %201, %202 in 1 : vector<8x241xf32>, vector<8x15xf32> -> vector<8x256xf32>
    %c6_69 = arith.constant 6 : index
    %c0_70 = arith.constant 0 : index
    %204 = vector.load %arg17[%c6_69, %c0_70] : memref<9x256xf32, #tpu.memory_space<vmem>>, vector<1x256xf32>
    %205 = vector.broadcast %204 : vector<1x256xf32> to vector<8x256xf32>
    %206 = arith.mulf %203, %205 : vector<8x256xf32>
    %207 = vector.extract_strided_slice %170 {offsets = [0, 16], sizes = [8, 240], strides = [1, 1]} : vector<8x256xf32> to vector<8x240xf32>
    %208 = vector.extract_strided_slice %170 {offsets = [0, 0], sizes = [8, 16], strides = [1, 1]} : vector<8x256xf32> to vector<8x16xf32>
    %209 = tpu.concatenate %207, %208 in 1 : vector<8x240xf32>, vector<8x16xf32> -> vector<8x256xf32>
    %c7_71 = arith.constant 7 : index
    %c0_72 = arith.constant 0 : index
    %210 = vector.load %arg17[%c7_71, %c0_72] : memref<9x256xf32, #tpu.memory_space<vmem>>, vector<1x256xf32>
    %211 = vector.broadcast %210 : vector<1x256xf32> to vector<8x256xf32>
    %212 = arith.mulf %209, %211 : vector<8x256xf32>
    %213 = vector.extract_strided_slice %170 {offsets = [0, 17], sizes = [8, 239], strides = [1, 1]} : vector<8x256xf32> to vector<8x239xf32>
    %214 = vector.extract_strided_slice %170 {offsets = [0, 0], sizes = [8, 17], strides = [1, 1]} : vector<8x256xf32> to vector<8x17xf32>
    %215 = tpu.concatenate %213, %214 in 1 : vector<8x239xf32>, vector<8x17xf32> -> vector<8x256xf32>
    %c8_73 = arith.constant 8 : index
    %c0_74 = arith.constant 0 : index
    %216 = vector.load %arg17[%c8_73, %c0_74] : memref<9x256xf32, #tpu.memory_space<vmem>>, vector<1x256xf32>
    %217 = vector.broadcast %216 : vector<1x256xf32> to vector<8x256xf32>
    %218 = arith.mulf %215, %217 : vector<8x256xf32>
    %219 = tpu.concatenate %176, %182, %188, %194, %170, %200, %206, %212, %218 in 0 : vector<8x256xf32>, vector<8x256xf32>, vector<8x256xf32>, vector<8x256xf32>, vector<8x256xf32>, vector<8x256xf32>, vector<8x256xf32>, vector<8x256xf32>, vector<8x256xf32> -> vector<72x256xf32>
    %c0_75 = arith.constant 0 : index
    %c0_76 = arith.constant 0 : index
    %220 = vector.load %arg10[%c0_75, %c0_76] : memref<4x72xbf16, #tpu.memory_space<vmem>>, vector<4x72xbf16>
    %221 = arith.truncf %219 : vector<72x256xf32> to vector<72x256xbf16>
    %cst_77 = arith.constant dense<0.000000e+00> : vector<4x256xf32>
    %222 = tpu.matmul %220, %221, %cst_77 {dimension_numbers = #tpu.dot_dimension_numbers<[1], [0], [0], [1], [0, 0, 1, 1], [], []>} : vector<4x72xbf16>, vector<72x256xbf16>, vector<4x256xf32> -> vector<4x256xf32>
    %c0_78 = arith.constant 0 : index
    %c0_79 = arith.constant 0 : index
    %223 = vector.load %arg11[%c0_78, %c0_79] : memref<4x1xf32, #tpu.memory_space<vmem>>, vector<4x1xf32>
    %224 = vector.broadcast %223 : vector<4x1xf32> to vector<4x256xf32>
    %225 = arith.addf %222, %224 : vector<4x256xf32>
    %cst_80 = arith.constant 5.000000e-01 : f32
    %226 = vector.broadcast %cst_80 : f32 to vector<4x256xf32>
    %227 = arith.mulf %226, %225 : vector<4x256xf32>
    %cst_81 = arith.constant 4.471500e-02 : f32
    %228 = vector.broadcast %cst_81 : f32 to vector<4x256xf32>
    %229 = arith.mulf %228, %225 : vector<4x256xf32>
    %230 = arith.mulf %229, %225 : vector<4x256xf32>
    %231 = arith.mulf %230, %225 : vector<4x256xf32>
    %232 = arith.addf %225, %231 : vector<4x256xf32>
    %cst_82 = arith.constant 0.797884583 : f32
    %233 = vector.broadcast %cst_82 : f32 to vector<4x256xf32>
    %234 = arith.mulf %233, %232 : vector<4x256xf32>
    %235 = math.tanh %234 : vector<4x256xf32>
    %cst_83 = arith.constant 1.000000e+00 : f32
    %236 = vector.broadcast %cst_83 : f32 to vector<4x256xf32>
    %237 = arith.addf %236, %235 : vector<4x256xf32>
    %238 = arith.mulf %227, %237 : vector<4x256xf32>
    %239 = vector.extract_strided_slice %238 {offsets = [0, 239], sizes = [4, 17], strides = [1, 1]} : vector<4x256xf32> to vector<4x17xf32>
    %240 = vector.extract_strided_slice %238 {offsets = [0, 0], sizes = [4, 239], strides = [1, 1]} : vector<4x256xf32> to vector<4x239xf32>
    %241 = tpu.concatenate %239, %240 in 1 : vector<4x17xf32>, vector<4x239xf32> -> vector<4x256xf32>
    %c0_84 = arith.constant 0 : index
    %c0_85 = arith.constant 0 : index
    %242 = vector.load %arg17[%c0_84, %c0_85] : memref<9x256xf32, #tpu.memory_space<vmem>>, vector<1x256xf32>
    %243 = vector.broadcast %242 : vector<1x256xf32> to vector<4x256xf32>
    %244 = arith.mulf %241, %243 : vector<4x256xf32>
    %245 = vector.extract_strided_slice %238 {offsets = [0, 240], sizes = [4, 16], strides = [1, 1]} : vector<4x256xf32> to vector<4x16xf32>
    %246 = vector.extract_strided_slice %238 {offsets = [0, 0], sizes = [4, 240], strides = [1, 1]} : vector<4x256xf32> to vector<4x240xf32>
    %247 = tpu.concatenate %245, %246 in 1 : vector<4x16xf32>, vector<4x240xf32> -> vector<4x256xf32>
    %c1_86 = arith.constant 1 : index
    %c0_87 = arith.constant 0 : index
    %248 = vector.load %arg17[%c1_86, %c0_87] : memref<9x256xf32, #tpu.memory_space<vmem>>, vector<1x256xf32>
    %249 = vector.broadcast %248 : vector<1x256xf32> to vector<4x256xf32>
    %250 = arith.mulf %247, %249 : vector<4x256xf32>
    %251 = vector.extract_strided_slice %238 {offsets = [0, 241], sizes = [4, 15], strides = [1, 1]} : vector<4x256xf32> to vector<4x15xf32>
    %252 = vector.extract_strided_slice %238 {offsets = [0, 0], sizes = [4, 241], strides = [1, 1]} : vector<4x256xf32> to vector<4x241xf32>
    %253 = tpu.concatenate %251, %252 in 1 : vector<4x15xf32>, vector<4x241xf32> -> vector<4x256xf32>
    %c2_88 = arith.constant 2 : index
    %c0_89 = arith.constant 0 : index
    %254 = vector.load %arg17[%c2_88, %c0_89] : memref<9x256xf32, #tpu.memory_space<vmem>>, vector<1x256xf32>
    %255 = vector.broadcast %254 : vector<1x256xf32> to vector<4x256xf32>
    %256 = arith.mulf %253, %255 : vector<4x256xf32>
    %257 = vector.extract_strided_slice %238 {offsets = [0, 255], sizes = [4, 1], strides = [1, 1]} : vector<4x256xf32> to vector<4x1xf32>
    %258 = vector.extract_strided_slice %238 {offsets = [0, 0], sizes = [4, 255], strides = [1, 1]} : vector<4x256xf32> to vector<4x255xf32>
    %259 = tpu.concatenate %257, %258 in 1 : vector<4x1xf32>, vector<4x255xf32> -> vector<4x256xf32>
    %c3_90 = arith.constant 3 : index
    %c0_91 = arith.constant 0 : index
    %260 = vector.load %arg17[%c3_90, %c0_91] : memref<9x256xf32, #tpu.memory_space<vmem>>, vector<1x256xf32>
    %261 = vector.broadcast %260 : vector<1x256xf32> to vector<4x256xf32>
    %262 = arith.mulf %259, %261 : vector<4x256xf32>
    %263 = vector.extract_strided_slice %238 {offsets = [0, 1], sizes = [4, 255], strides = [1, 1]} : vector<4x256xf32> to vector<4x255xf32>
    %264 = vector.extract_strided_slice %238 {offsets = [0, 0], sizes = [4, 1], strides = [1, 1]} : vector<4x256xf32> to vector<4x1xf32>
    %265 = tpu.concatenate %263, %264 in 1 : vector<4x255xf32>, vector<4x1xf32> -> vector<4x256xf32>
    %c5_92 = arith.constant 5 : index
    %c0_93 = arith.constant 0 : index
    %266 = vector.load %arg17[%c5_92, %c0_93] : memref<9x256xf32, #tpu.memory_space<vmem>>, vector<1x256xf32>
    %267 = vector.broadcast %266 : vector<1x256xf32> to vector<4x256xf32>
    %268 = arith.mulf %265, %267 : vector<4x256xf32>
    %269 = vector.extract_strided_slice %238 {offsets = [0, 15], sizes = [4, 241], strides = [1, 1]} : vector<4x256xf32> to vector<4x241xf32>
    %270 = vector.extract_strided_slice %238 {offsets = [0, 0], sizes = [4, 15], strides = [1, 1]} : vector<4x256xf32> to vector<4x15xf32>
    %271 = tpu.concatenate %269, %270 in 1 : vector<4x241xf32>, vector<4x15xf32> -> vector<4x256xf32>
    %c6_94 = arith.constant 6 : index
    %c0_95 = arith.constant 0 : index
    %272 = vector.load %arg17[%c6_94, %c0_95] : memref<9x256xf32, #tpu.memory_space<vmem>>, vector<1x256xf32>
    %273 = vector.broadcast %272 : vector<1x256xf32> to vector<4x256xf32>
    %274 = arith.mulf %271, %273 : vector<4x256xf32>
    %275 = vector.extract_strided_slice %238 {offsets = [0, 16], sizes = [4, 240], strides = [1, 1]} : vector<4x256xf32> to vector<4x240xf32>
    %276 = vector.extract_strided_slice %238 {offsets = [0, 0], sizes = [4, 16], strides = [1, 1]} : vector<4x256xf32> to vector<4x16xf32>
    %277 = tpu.concatenate %275, %276 in 1 : vector<4x240xf32>, vector<4x16xf32> -> vector<4x256xf32>
    %c7_96 = arith.constant 7 : index
    %c0_97 = arith.constant 0 : index
    %278 = vector.load %arg17[%c7_96, %c0_97] : memref<9x256xf32, #tpu.memory_space<vmem>>, vector<1x256xf32>
    %279 = vector.broadcast %278 : vector<1x256xf32> to vector<4x256xf32>
    %280 = arith.mulf %277, %279 : vector<4x256xf32>
    %281 = vector.extract_strided_slice %238 {offsets = [0, 17], sizes = [4, 239], strides = [1, 1]} : vector<4x256xf32> to vector<4x239xf32>
    %282 = vector.extract_strided_slice %238 {offsets = [0, 0], sizes = [4, 17], strides = [1, 1]} : vector<4x256xf32> to vector<4x17xf32>
    %283 = tpu.concatenate %281, %282 in 1 : vector<4x239xf32>, vector<4x17xf32> -> vector<4x256xf32>
    %c8_98 = arith.constant 8 : index
    %c0_99 = arith.constant 0 : index
    %284 = vector.load %arg17[%c8_98, %c0_99] : memref<9x256xf32, #tpu.memory_space<vmem>>, vector<1x256xf32>
    %285 = vector.broadcast %284 : vector<1x256xf32> to vector<4x256xf32>
    %286 = arith.mulf %283, %285 : vector<4x256xf32>
    %287 = tpu.concatenate %244, %250, %256, %262, %238, %268, %274, %280, %286 in 0 : vector<4x256xf32>, vector<4x256xf32>, vector<4x256xf32>, vector<4x256xf32>, vector<4x256xf32>, vector<4x256xf32>, vector<4x256xf32>, vector<4x256xf32>, vector<4x256xf32> -> vector<36x256xf32>
    %c0_100 = arith.constant 0 : index
    %c0_101 = arith.constant 0 : index
    %288 = vector.load %arg12[%c0_100, %c0_101] : memref<4x36xbf16, #tpu.memory_space<vmem>>, vector<4x36xbf16>
    %289 = arith.truncf %287 : vector<36x256xf32> to vector<36x256xbf16>
    %cst_102 = arith.constant dense<0.000000e+00> : vector<4x256xf32>
    %290 = tpu.matmul %288, %289, %cst_102 {dimension_numbers = #tpu.dot_dimension_numbers<[1], [0], [0], [1], [0, 0, 1, 1], [], []>} : vector<4x36xbf16>, vector<36x256xbf16>, vector<4x256xf32> -> vector<4x256xf32>
    %c0_103 = arith.constant 0 : index
    %c0_104 = arith.constant 0 : index
    %291 = vector.load %arg13[%c0_103, %c0_104] : memref<4x1xf32, #tpu.memory_space<vmem>>, vector<4x1xf32>
    %292 = vector.broadcast %291 : vector<4x1xf32> to vector<4x256xf32>
    %293 = arith.addf %290, %292 : vector<4x256xf32>
    %cst_105 = arith.constant 5.000000e-01 : f32
    %294 = vector.broadcast %cst_105 : f32 to vector<4x256xf32>
    %295 = arith.mulf %294, %293 : vector<4x256xf32>
    %cst_106 = arith.constant 4.471500e-02 : f32
    %296 = vector.broadcast %cst_106 : f32 to vector<4x256xf32>
    %297 = arith.mulf %296, %293 : vector<4x256xf32>
    %298 = arith.mulf %297, %293 : vector<4x256xf32>
    %299 = arith.mulf %298, %293 : vector<4x256xf32>
    %300 = arith.addf %293, %299 : vector<4x256xf32>
    %cst_107 = arith.constant 0.797884583 : f32
    %301 = vector.broadcast %cst_107 : f32 to vector<4x256xf32>
    %302 = arith.mulf %301, %300 : vector<4x256xf32>
    %303 = math.tanh %302 : vector<4x256xf32>
    %cst_108 = arith.constant 1.000000e+00 : f32
    %304 = vector.broadcast %cst_108 : f32 to vector<4x256xf32>
    %305 = arith.addf %304, %303 : vector<4x256xf32>
    %306 = arith.mulf %295, %305 : vector<4x256xf32>
    %307 = vector.extract_strided_slice %306 {offsets = [0, 1], sizes = [4, 255], strides = [1, 1]} : vector<4x256xf32> to vector<4x255xf32>
    %308 = vector.extract_strided_slice %306 {offsets = [0, 0], sizes = [4, 1], strides = [1, 1]} : vector<4x256xf32> to vector<4x1xf32>
    %309 = tpu.concatenate %307, %308 in 1 : vector<4x255xf32>, vector<4x1xf32> -> vector<4x256xf32>
    %c5_109 = arith.constant 5 : index
    %c0_110 = arith.constant 0 : index
    %310 = vector.load %arg17[%c5_109, %c0_110] : memref<9x256xf32, #tpu.memory_space<vmem>>, vector<1x256xf32>
    %311 = vector.broadcast %310 : vector<1x256xf32> to vector<4x256xf32>
    %312 = arith.mulf %309, %311 : vector<4x256xf32>
    %313 = vector.extract_strided_slice %306 {offsets = [0, 16], sizes = [4, 240], strides = [1, 1]} : vector<4x256xf32> to vector<4x240xf32>
    %314 = vector.extract_strided_slice %306 {offsets = [0, 0], sizes = [4, 16], strides = [1, 1]} : vector<4x256xf32> to vector<4x16xf32>
    %315 = tpu.concatenate %313, %314 in 1 : vector<4x240xf32>, vector<4x16xf32> -> vector<4x256xf32>
    %c7_111 = arith.constant 7 : index
    %c0_112 = arith.constant 0 : index
    %316 = vector.load %arg17[%c7_111, %c0_112] : memref<9x256xf32, #tpu.memory_space<vmem>>, vector<1x256xf32>
    %317 = vector.broadcast %316 : vector<1x256xf32> to vector<4x256xf32>
    %318 = arith.mulf %315, %317 : vector<4x256xf32>
    %319 = vector.extract_strided_slice %306 {offsets = [0, 17], sizes = [4, 239], strides = [1, 1]} : vector<4x256xf32> to vector<4x239xf32>
    %320 = vector.extract_strided_slice %306 {offsets = [0, 0], sizes = [4, 17], strides = [1, 1]} : vector<4x256xf32> to vector<4x17xf32>
    %321 = tpu.concatenate %319, %320 in 1 : vector<4x239xf32>, vector<4x17xf32> -> vector<4x256xf32>
    %c8_113 = arith.constant 8 : index
    %c0_114 = arith.constant 0 : index
    %322 = vector.load %arg17[%c8_113, %c0_114] : memref<9x256xf32, #tpu.memory_space<vmem>>, vector<1x256xf32>
    %323 = vector.broadcast %322 : vector<1x256xf32> to vector<4x256xf32>
    %324 = arith.mulf %321, %323 : vector<4x256xf32>
    %325 = tpu.concatenate %306, %312, %318, %324 in 0 : vector<4x256xf32>, vector<4x256xf32>, vector<4x256xf32>, vector<4x256xf32> -> vector<16x256xf32>
    %c0_115 = arith.constant 0 : index
    %c0_116 = arith.constant 0 : index
    %326 = vector.load %arg14[%c0_115, %c0_116] : memref<12x16xbf16, #tpu.memory_space<vmem>>, vector<12x16xbf16>
    %327 = arith.truncf %325 : vector<16x256xf32> to vector<16x256xbf16>
    %cst_117 = arith.constant dense<0.000000e+00> : vector<12x256xf32>
    %328 = tpu.matmul %326, %327, %cst_117 {dimension_numbers = #tpu.dot_dimension_numbers<[1], [0], [0], [1], [0, 0, 1, 1], [], []>} : vector<12x16xbf16>, vector<16x256xbf16>, vector<12x256xf32> -> vector<12x256xf32>
    %c0_118 = arith.constant 0 : index
    %c0_119 = arith.constant 0 : index
    %329 = vector.load %arg15[%c0_118, %c0_119] : memref<12x1xf32, #tpu.memory_space<vmem>>, vector<12x1xf32>
    %330 = vector.broadcast %329 : vector<12x1xf32> to vector<12x256xf32>
    %331 = arith.addf %328, %330 : vector<12x256xf32>
    %332 = math.tanh %331 : vector<12x256xf32>
    %c0_120 = arith.constant 0 : index
    %c0_121 = arith.constant 0 : index
    %c0_122 = arith.constant 0 : index
    %333 = vector.load %arg18[%c0_120, %c0_121, %c0_122] : memref<1x12x256xf32, #tpu.memory_space<vmem>>, vector<1x12x256xf32>
    %334 = vector.shape_cast %333 : vector<1x12x256xf32> to vector<12x256xf32>
    %335 = vector.shape_cast %332 : vector<12x256xf32> to vector<1x12x256xf32>
    tpu.vector_store %arg18[%c0_120, %c0_121, %c0_122], %335 {strides = array<i32>} : memref<1x12x256xf32, #tpu.memory_space<vmem>>, vector<1x12x256xf32>,
    return
  }
  func.func @transform_0(%arg0: i32) -> (i32, i32, i32) {
    %c0_i32 = arith.constant 0 : i32
    %c0_i32_0 = arith.constant 0 : i32
    %c0_i32_1 = arith.constant 0 : i32
    return %arg0, %c0_i32, %c0_i32_0 : i32, i32, i32
  }
  func.func @transform_1(%arg0: i32) -> (i32, i32) {
    %c0_i32 = arith.constant 0 : i32
    %c0_i32_0 = arith.constant 0 : i32
    %c0_i32_1 = arith.constant 0 : i32
    return %c0_i32, %c0_i32_0 : i32, i32
  }
  func.func @transform_2(%arg0: i32) -> (i32, i32) {
    %c0_i32 = arith.constant 0 : i32
    %c0_i32_0 = arith.constant 0 : i32
    %c0_i32_1 = arith.constant 0 : i32
    return %c0_i32, %c0_i32_0 : i32, i32
  }
  func.func @transform_3(%arg0: i32) -> (i32, i32) {
    %c0_i32 = arith.constant 0 : i32
    %c0_i32_0 = arith.constant 0 : i32
    %c0_i32_1 = arith.constant 0 : i32
    return %c0_i32, %c0_i32_0 : i32, i32
  }
  func.func @transform_4(%arg0: i32) -> (i32, i32) {
    %c0_i32 = arith.constant 0 : i32
    %c0_i32_0 = arith.constant 0 : i32
    %c0_i32_1 = arith.constant 0 : i32
    return %c0_i32, %c0_i32_0 : i32, i32
  }
  func.func @transform_5(%arg0: i32) -> (i32, i32) {
    %c0_i32 = arith.constant 0 : i32
    %c0_i32_0 = arith.constant 0 : i32
    %c0_i32_1 = arith.constant 0 : i32
    return %c0_i32, %c0_i32_0 : i32, i32
  }
  func.func @transform_6(%arg0: i32) -> (i32, i32) {
    %c0_i32 = arith.constant 0 : i32
    %c0_i32_0 = arith.constant 0 : i32
    %c0_i32_1 = arith.constant 0 : i32
    return %c0_i32, %c0_i32_0 : i32, i32
  }
  func.func @transform_7(%arg0: i32) -> (i32, i32) {
    %c0_i32 = arith.constant 0 : i32
    %c0_i32_0 = arith.constant 0 : i32
    %c0_i32_1 = arith.constant 0 : i32
    return %c0_i32, %c0_i32_0 : i32, i32
  }
  func.func @transform_8(%arg0: i32) -> (i32, i32) {
    %c0_i32 = arith.constant 0 : i32
    %c0_i32_0 = arith.constant 0 : i32
    %c0_i32_1 = arith.constant 0 : i32
    return %c0_i32, %c0_i32_0 : i32, i32
  }
  func.func @transform_9(%arg0: i32) -> (i32, i32) {
    %c0_i32 = arith.constant 0 : i32
    %c0_i32_0 = arith.constant 0 : i32
    %c0_i32_1 = arith.constant 0 : i32
    return %c0_i32, %c0_i32_0 : i32, i32
  }
  func.func @transform_10(%arg0: i32) -> (i32, i32) {
    %c0_i32 = arith.constant 0 : i32
    %c0_i32_0 = arith.constant 0 : i32
    %c0_i32_1 = arith.constant 0 : i32
    return %c0_i32, %c0_i32_0 : i32, i32
  }
  func.func @transform_11(%arg0: i32) -> (i32, i32) {
    %c0_i32 = arith.constant 0 : i32
    %c0_i32_0 = arith.constant 0 : i32
    %c0_i32_1 = arith.constant 0 : i32
    return %c0_i32, %c0_i32_0 : i32, i32
  }
  func.func @transform_12(%arg0: i32) -> (i32, i32) {
    %c0_i32 = arith.constant 0 : i32
    %c0_i32_0 = arith.constant 0 : i32
    %c0_i32_1 = arith.constant 0 : i32
    return %c0_i32, %c0_i32_0 : i32, i32
  }
  func.func @transform_13(%arg0: i32) -> (i32, i32) {
    %c0_i32 = arith.constant 0 : i32
    %c0_i32_0 = arith.constant 0 : i32
    %c0_i32_1 = arith.constant 0 : i32
    return %c0_i32, %c0_i32_0 : i32, i32
  }
  func.func @transform_14(%arg0: i32) -> (i32, i32) {
    %c0_i32 = arith.constant 0 : i32
    %c0_i32_0 = arith.constant 0 : i32
    %c0_i32_1 = arith.constant 0 : i32
    return %c0_i32, %c0_i32_0 : i32, i32
  }
  func.func @transform_15(%arg0: i32) -> (i32, i32) {
    %c0_i32 = arith.constant 0 : i32
    %c0_i32_0 = arith.constant 0 : i32
    %c0_i32_1 = arith.constant 0 : i32
    return %c0_i32, %c0_i32_0 : i32, i32
  }
  func.func @transform_16(%arg0: i32) -> (i32, i32) {
    %c0_i32 = arith.constant 0 : i32
    %c0_i32_0 = arith.constant 0 : i32
    %c0_i32_1 = arith.constant 0 : i32
    return %c0_i32, %c0_i32_0 : i32, i32
  }
  func.func @transform_17(%arg0: i32) -> (i32, i32, i32) {
    %c0_i32 = arith.constant 0 : i32
    %c0_i32_0 = arith.constant 0 : i32
    %c0_i32_1 = arith.constant 0 : i32
    return %arg0, %c0_i32, %c0_i32_0 : i32, i32, i32
  }
}

</mosaic_0001>

<bundles_post_ra>
// kernel: tpu_custom_call.1
= control target key start
LH: loop header
LB: loop body
LE: loop exit
PB: predicated region body
PF: predicated region fallthrough
CT: control target
= control target key end

     0   :  { %6 = vsyncpa [#allocation3], 0  ;;  %s137_s0 = inlined_call_operand.hbm [shape: f32[4,256], index: 0, kind: input, shape index: {}]   ;;  %s138_s1 = inlined_call_operand.hbm [shape: f32[4,256], index: 1, kind: output, shape index: {}]  }
   0x1   :  { %7 = vsyncpa [#allocation4], 0  ;;  %s13_s8 = sshll.u32 %s137_s0, 4  ;;  %s118_s9 = smov [#allocation2]   ;;  %s14_s8 = int_to_ptr.hbm [resolvable:$true] %s13_s8 }
   0x2   :  { %s15_s10 = sshll.u32 %s118_s9, 4  ;;  %s16_s10 = int_to_ptr.vmem [resolvable:$true] %s15_s10 }
   0x3   :  { %18 = dma.hbm_to_vmem [thread:$0]  %s14_s8, 128, %s16_s10, [#allocation3]  }
   0x4   :  { %114 = dma.done.wait [#allocation3], 128  }
   0x5   :  { %115 = vsyncadd [#allocation3], 4294967168  ;;  %v23_v0 = vld [vmem:[#allocation2] sm:$0xff]  ;;  %s119_s11 = smov 112   ;;  %v34_v3 = vlaneseq  ;;  %s120_s0 = smov [#allocation5]   ;;  %vm42_vm1 = vcmask 1043456  }
   0x6   :  { %25 = vst [vmem:[#allocation1] ss:$2 sm:$0xff] %v23_v0  ;;  %s51_s12 = sshll.u32 %s120_s0, 4  ;;  %s53_s15 = sshll.u32 %s138_s1, 4  ;;  %s52_s12 = int_to_ptr.vmem [resolvable:$true] %s51_s12  ;;  %s54_s15 = int_to_ptr.hbm [resolvable:$true] %s53_s15 }
   0x7   :  { %v35_v5 = vand.u32 127, %v34_v3 }
   0x9   :  { %vm36_vm0 = vcmp.lt.s32.totalorder %v35_v5, 112 }
   0xd   :  { %v26_v1 = vld.sshfl [vmem:[#allocation1] sm:$0xff pattern:$0x75316420]  ;;  %v27_v2 = vld.sshfl [vmem:[#allocation1 + $0x8] sm:$0xff pattern:$0x75316420] }
   0xe   :  { %30 = vrot.lane.b32.xlu0 %v26_v1, %s119_s11 }
  0x16   :  { %32 = vrot.lane.b32.xlu0 %v27_v2, %s119_s11 }
  0x80   :  { %v31_v4 = vpop.permute.xlu0 %30 }
  0x88   :  { %v33_v6 = vpop.permute.xlu0 %32 }
  0x89   :  { %v38_v7 = vsel %vm36_vm0, %v33_v6, %v31_v4  ;;  %v37_v9 = vsel %vm36_vm0, %v31_v4, %v33_v6 }
  0x8a   :  { %v41_v8 = vrot.slane %v38_v7, 4 }
  0x8c   :  { %v43_v10 = vsel %vm42_vm1, %v37_v9, %v41_v8 }
  0x8d   :  { %45 = vst [vmem:[#allocation5] sm:$0xff] %v43_v10 }
  0x8e   :  { %56 = dma.vmem_to_hbm [thread:$0]  %s52_s12, 128, %s54_s15, [#allocation4]  }
  0x8f   :  { %116 = dma.done.wait [#allocation4], 128  }
  0x90   :  { %117 = vsyncadd [#allocation4], 4294967168 }
  0x91   :  { %61 = vsyncpa [#allocation3], 1 }
  0x92   :  { %62 = vsyncpa [#allocation4], 1 }

// kernel: decoder_forward.1
= control target key start
LH: loop header
LB: loop body
LE: loop exit
PB: predicated region body
PF: predicated region fallthrough
CT: control target
= control target key end

     0   :  { %s3245_s0 = inlined_call_operand.hbm [shape: f32[2,1,32], index: 0, kind: input, shape index: {}]   ;;  %s3246_s1 = inlined_call_operand.hbm [shape: bf16[32,128], index: 1, kind: input, shape index: {}]   ;;  %s3247_s2 = inlined_call_operand.hbm [shape: f32[1,128], index: 2, kind: input, shape index: {}]   ;;  %s3248_s3 = inlined_call_operand.hbm [shape: bf16[16,64], index: 3, kind: input, shape index: {}]   ;;  %s3249_s4 = inlined_call_operand.hbm [shape: bf16[64,256], index: 4, kind: input, shape index: {}]   ;;  %s3250_s5 = inlined_call_operand.hbm [shape: bf16[8,72], index: 5, kind: input, shape index: {}]   ;;  %s3251_s6 = inlined_call_operand.vmem [shape: f32[8,1], index: 6, kind: input, shape index: {}]   ;;  %s3252_s7 = inlined_call_operand.hbm [shape: bf16[8,72], index: 7, kind: input, shape index: {}]   ;;  %s3253_s8 = inlined_call_operand.vmem [shape: f32[8,1], index: 8, kind: input, shape index: {}]   ;;  %s3254_s9 = inlined_call_operand.hbm [shape: bf16[4,72], index: 9, kind: input, shape index: {}]   ;;  %s3255_s10 = inlined_call_operand.vmem [shape: f32[4,1], index: 10, kind: input, shape index: {}]   ;;  %s3256_s11 = inlined_call_operand.hbm [shape: bf16[4,36], index: 11, kind: input, shape index: {}]   ;;  %s3257_s12 = inlined_call_operand.vmem [shape: f32[4,1], index: 12, kind: input, shape index: {}]   ;;  %s3258_s13 = inlined_call_operand.hbm [shape: bf16[12,16], index: 13, kind: input, shape index: {}]   ;;  %s3259_s14 = inlined_call_operand.vmem [shape: f32[12,1], index: 14, kind: input, shape index: {}]   ;;  %s3260_s15 = inlined_call_operand.hbm [shape: f32[9,64], index: 15, kind: input, shape index: {}]   ;;  %s3261_s16 = inlined_call_operand.hbm [shape: f32[9,256], index: 16, kind: input, shape index: {}]   ;;  %s3262_s17 = inlined_call_operand.vmem [shape: f32[2,12,256], index: 17, kind: output, shape index: {}]  }
   0x1   :  { %3271 = sst [smem:[#allocation28_spill]] %s3245_s0 }
   0x2   :  { %3272 = sst [smem:[#allocation29_spill]] %s3246_s1 }
   0x3   :  { %3273 = sst [smem:[#allocation30_spill]] %s3248_s3 }
   0x4   :  { %3274 = sst [smem:[#allocation31_spill]] %s3250_s5 }
   0x5   :  { %3275 = sst [smem:[#allocation32_spill]] %s3251_s6 }
   0x6   :  { %3276 = sst [smem:[#allocation33_spill]] %s3253_s8 }
   0x7   :  { %3277 = sst [smem:[#allocation34_spill]] %s3255_s10 }
   0x8   :  { %3278 = sst [smem:[#allocation35_spill]] %s3257_s12 }
   0x9   :  { %3279 = sst [smem:[#allocation36_spill]] %s3259_s14 }
   0xa   :  { %3280 = sst [smem:[#allocation37_spill]] %s3262_s17 }
   0xb   :  { %22 = vsyncpa [#allocation3], 0 }
   0xc   :  { %24 = vsyncpa [#allocation3 + $0x1], 0 }
   0xd   :  { %25 = vsyncpa [#allocation5], 0 }
   0xe   :  { %26 = vsyncpa [#allocation8], 0 }
   0xf   :  { %27 = vsyncpa [#allocation11], 0 }
  0x10   :  { %28 = vsyncpa [#allocation14], 0 }
  0x11   :  { %29 = vsyncpa [#allocation17], 0 }
  0x12   :  { %30 = vsyncpa [#allocation20], 0  ;;  %s2729_s24 = smov 0   ;;  %s2731_s25 = smov 0  }
  0x13   :  { %s2733_s26 = smov 0   ;;  %s2735_s27 = smov 0  }
  0x14 LB: > { %s3281_s0 = sld [smem:[#allocation29_spill]]  ;;  %s2753_s18 = sadd.s32 4294967295, %s2592_s27   ;;  %s2592_s27 = sphi %s2735_s27, %s3302_s27   ;;  %s2588_s26 = sphi %s2733_s26, %s3301_s26   ;;  %s2584_s25 = sphi %s2731_s25, %s3300_s25   ;;  %s2580_s24 = sphi %s2729_s24, %s3299_s24  }
  0x15   : > { %p1855_p0 = scmp.ge.s32.totalorder %s2592_s27, 1  ;;  %p57_p1 = scmp.eq.s32.totalorder %s2753_s18, 0 }
  0x16   : > { %p429_p2 = scmp.lt.s32.totalorder %s2592_s27, 3  ;;  %s2594_s1 = smov [#allocation4]  }
  0x17   : > { %s442_s20 = sshll.u32 %s2594_s1, 4  ;;  %s3283_s3 = sld [smem:[#allocation30_spill]]  ;;  %s443_s20 = int_to_ptr.vmem [resolvable:$true] %s442_s20 }
  0x18   : > { %p2758_p3 = pnand %p1855_p0, %p429_p2  ;;  %s3285_s5 = sld [smem:[#allocation31_spill]] }
  0x19   : > { %s2595_s17 = smov [#allocation7]   ;;  %s2596_s12 = smov 64  }
  0x1a   : > { %s440_s30 = sshll.u32 %s3281_s0, 4  ;;  %p2003_p4 = pneg %p2758_p3  ;;  %s441_s30 = int_to_ptr.hbm [resolvable:$true] %s440_s30 }
  0x1b   : > { %s468_s14 = sshll.u32 %s2595_s17, 4  ;;  %s2597_s10 = smov 4   ;;  %s469_s14 = int_to_ptr.vmem [resolvable:$true] %s468_s14 }
  0x1c   : > { %p2769_p5 = pnand %p2003_p4, %p57_p1  ;;  %s2598_s8 = smov [#allocation10]  }
  0x1d   : > { %s466_s23 = sshll.u32 %s3283_s3, 4  ;;  %s525_s3 = sshll.u32 %s3254_s9, 4  ;;  %s467_s23 = int_to_ptr.hbm [resolvable:$true] %s466_s23  ;;  %s526_s3 = int_to_ptr.hbm [resolvable:$true] %s525_s3 }
  0x1e   : > { %s495_s1 = sshll.u32 %s3285_s5, 4  ;;  %s497_s6 = sshll.u32 %s2598_s8, 4  ;;  %s496_s1 = int_to_ptr.hbm [resolvable:$true] %s495_s1  ;;  %s498_s6 = int_to_ptr.vmem [resolvable:$true] %s497_s6 }
  0x1f   : > { %2006 = dma.hbm_to_vmem [thread:$0]  (!%p2769_p5), %s441_s30, 256, %s443_s20, [#allocation5], %s2596_s12, %s2596_s12, %s2597_s10  }
  0x20   : > { %2012 = dma.hbm_to_vmem [thread:$0]  (!%p2769_p5), %s467_s23, 128, %s469_s14, [#allocation8], %s2596_s12, %s2596_s12, %s2597_s10  }
  0x21   : > { %2018 = dma.hbm_to_vmem [thread:$0]  (!%p2769_p5), %s496_s1, 64, %s498_s6, [#allocation11]  }
  0x22   : > { %s2599_s17 = smov [#allocation13]   ;;  %s554_s30 = sshll.u32 %s3258_s13, 4  ;;  %s555_s30 = int_to_ptr.hbm [resolvable:$true] %s554_s30 }
  0x23   : > { %s527_s29 = sshll.u32 %s2599_s17, 4  ;;  %s455_s23 = sshll.u32 %s3247_s2, 4  ;;  %s528_s29 = int_to_ptr.vmem [resolvable:$true] %s527_s29  ;;  %s456_s23 = int_to_ptr.hbm [resolvable:$true] %s455_s23 }
  0x24   : > { %2024 = dma.hbm_to_vmem [thread:$0]  (!%p2769_p5), %s526_s3, 32, %s528_s29, [#allocation14]  }
  0x25   : > { %s2600_s8 = smov [#allocation16]   ;;  %s2601_s6 = smov [#allocation6]  }
  0x26   : > { %s556_s21 = sshll.u32 %s2600_s8, 4  ;;  %s457_s1 = sshll.u32 %s2601_s6, 4  ;;  %s557_s21 = int_to_ptr.vmem [resolvable:$true] %s556_s21  ;;  %s458_s1 = int_to_ptr.vmem [resolvable:$true] %s457_s1 }
  0x27   : > { %2030 = dma.hbm_to_vmem [thread:$0]  (!%p2769_p5), %s555_s30, 128, %s557_s21, [#allocation17], %s2596_s12, %s2596_s12, %s2597_s10  }
  0x28   : > { %s480_s17 = sshll.u32 %s3249_s4, 4  ;;  %s2602_s3 = smov [#allocation9]   ;;  %s481_s17 = int_to_ptr.hbm [resolvable:$true] %s480_s17 }
  0x29   : > { %2009 = dma.hbm_to_vmem [thread:$0]  (!%p2769_p5), %s456_s23, 16, %s458_s1, [#allocation5]  }
  0x2a   : > { %s482_s29 = sshll.u32 %s2602_s3, 4  ;;  %s510_s20 = sshll.u32 %s3252_s7, 4  ;;  %s483_s29 = int_to_ptr.vmem [resolvable:$true] %s482_s29  ;;  %s511_s20 = int_to_ptr.hbm [resolvable:$true] %s510_s20 }
  0x2b   : > { %s2603_s10 = smov 128   ;;  %s2604_s12 = smov 8  }
  0x2c   : > { %2015 = dma.hbm_to_vmem [thread:$0]  (!%p2769_p5), %s481_s17, 1024, %s483_s29, [#allocation8], %s2603_s10, %s2603_s10, %s2604_s12  }
  0x2d   : > { %s2605_s30 = smov [#allocation12]   ;;  %s540_s23 = sshll.u32 %s3256_s11, 4  ;;  %s541_s23 = int_to_ptr.hbm [resolvable:$true] %s540_s23 }
  0x2e   : > { %s512_s8 = sshll.u32 %s2605_s30, 4  ;;  %s571_s22 = sshll.u32 %s3260_s15, 4  ;;  %s513_s8 = int_to_ptr.vmem [resolvable:$true] %s512_s8  ;;  %s572_s22 = int_to_ptr.hbm [resolvable:$true] %s571_s22 }
  0x2f   : > { %2021 = dma.hbm_to_vmem [thread:$0]  (!%p2769_p5), %s511_s20, 64, %s513_s8, [#allocation11]  }
  0x30   : > { %s2606_s3 = smov [#allocation15]   ;;  %s2607_s17 = smov [#allocation18]  }
  0x31   : > { %s542_s0 = sshll.u32 %s2606_s3, 4  ;;  %s573_s29 = sshll.u32 %s2607_s17, 4  ;;  %s543_s0 = int_to_ptr.vmem [resolvable:$true] %s542_s0  ;;  %s574_s29 = int_to_ptr.vmem [resolvable:$true] %s573_s29 }
  0x32   : > { %2027 = dma.hbm_to_vmem [thread:$0]  (!%p2769_p5), %s541_s23, 32, %s543_s0, [#allocation14]  }
  0x33   : > { %s585_s30 = sshll.u32 %s3261_s16, 4  ;;  %s2608_s8 = smov [#allocation19]   ;;  %s586_s30 = int_to_ptr.hbm [resolvable:$true] %s585_s30 }
  0x34   : > { %2033 = dma.hbm_to_vmem [thread:$0]  (!%p2769_p5), %s572_s22, 256, %s574_s29, [#allocation17], %s2603_s10, %s2603_s10, %s2604_s12  }
  0x35   : > { %s587_s21 = sshll.u32 %s2608_s8, 4  ;;  %s2609_s6 = smov 256   ;;  %s588_s21 = int_to_ptr.vmem [resolvable:$true] %s587_s21 }
  0x36   : > { %s2610_s23 = smov 16   ;;  %s2823_s1 = sadd.s32 1, %s2592_s27  }
  0x37   : > { %2036 = dma.hbm_to_vmem [thread:$0]  (!%p2769_p5), %s586_s30, 512, %s588_s21, [#allocation20], %s2609_s6, %s2609_s6, %s2610_s23  }
  0x38   : > { %s40_s5 = ssub.s32 %s2592_s27, %s2823_s1  ;;  %s43_s3 = sadd.s32 1, %s2588_s26 }
  0x39   : > { %p41_p6 = scmp.eq.s32.totalorder %s40_s5, 0  ;;  %p50_p7 = scmp.ne.s32.totalorder %s2588_s26, %s2584_s25 }
  0x3a   : > { %p51_p8 = scmp.eq.s32.totalorder %s2592_s27, 0  ;;  %p56_p9 = scmp.ne.s32.totalorder %s2584_s25, %s2580_s24 }
  0x3b   : > { %s2834_s10 = scalar_select %p41_p6, %s2588_s26, %s43_s3  }
  0x3c   : > { %p52_p10 = por %p51_p8, %p50_p7  ;;  %p2838_p11 = por %p57_p1, %p56_p9 }
  0x3d   : > { %p2052_p12 = scmp.lt.s32.totalorder %s2592_s27, 2  ;;  %s601_s28 = sand.u32 1, %s2588_s26  }
  0x3e   : > { %s3287_s17 = sld [smem:[#allocation28_spill]]  ;;  %s604_s14 = scalar_lea.vmem [#allocation2], %s601_s28 }
  0x3f   : > { %s611_s20 = sshll.u32 %s604_s14, 4  ;;  %p2848_p13 = pnand %p2052_p12, %p52_p10  ;;  %s612_s20 = int_to_ptr.vmem [resolvable:$true] %s611_s20 }
  0x40   : > { %s602_s8 = scalar_lea.sflag [#allocation3], %s601_s28 }
  0x41   : > { %p2508_p2 = pneg %p2848_p13 }
  0x44   : > { %s607_s29 = scalar_lea.hbm %s3287_s17, %s2592_s27  ;;  %s2511_s5 = scalar_lea.hbm %s3287_s17, 2 }
  0x45   : > { %s609_s30 = sshll.u32 %s607_s29, 4  ;;  %s610_s30 = int_to_ptr.hbm [resolvable:$true] %s609_s30 }
  0x46   : > { %s2504_s21 = sshra.s32 %s610_s30, 4  ;;  %s2505_s21 = int_to_ptr.hbm [resolvable:$true] %s2504_s21 }
  0x47   : > { %s2506_s6 = scalar_lea.hbm %s2505_s21, 1  ;;  %p2512_p6 = scmp.lt.s32.totalorder %s2505_s21, %s3287_s17 }
  0x48   : > { %p2507_p0 = scmp.ne.s32.totalorder %s2505_s21, %s2506_s6  ;;  %p2513_p7 = scmp.lt.s32.totalorder %s2511_s5, %s2506_s6 }
  0x4a   : > { %p2509_p4 = pnand %p2508_p2, %p2507_p0  ;;  %p2514_p8 = por %p2513_p7, %p2512_p6 }
  0x4c   : > { %p2510_p5 = pneg %p2509_p4 }
  0x4e   : > { %p2515_p9 = pnand %p2514_p8, %p2510_p5 }
  0x50   : > { %2518 = shalt.err (!%p2515_p9)
}
  0x51   : > { %2040 = dma.hbm_to_vmem [thread:$0]  (!%p2848_p13), %s610_s30, 16, %s612_s20, %s602_s8  }
  0x52   : > { %620 = sbr.rel (%p2758_p3) target bundleno = 2194 (0x892), region = 88  ;;  %s622_s28 = sand.u32 (!%p2758_p3), 1, %s2584_s25  }
  0x53   : > { %s623_s0 = scalar_lea.sflag (!%p2758_p3), [#allocation3], %s622_s28  ;;  %s625_s29 = scalar_lea.vmem (!%p2758_p3), [#allocation2], %s622_s28 }
  0x57   : > { %2551 = dma.done.wait (%p2838_p11), %s623_s0, 16  }
  0x58   : > { %2553 = vsyncadd (%p2838_p11), %s623_s0, 4294967280 }
  0x59   : > { %2555 = dma.done.wait (%p57_p1), [#allocation5], 272  }
  0x5a   : > { %2557 = vsyncadd (%p57_p1), [#allocation5], 4294967024 }
  0x5b   : > { %2559 = dma.done.wait (%p57_p1), [#allocation8], 1152  }
  0x5c   : > { %2561 = vsyncadd (%p57_p1), [#allocation8], 4294966144 }
  0x5d   : > { %2563 = dma.done.wait (%p57_p1), [#allocation11], 128  }
  0x5e   : > { %2565 = vsyncadd (%p57_p1), [#allocation11], 4294967168 }
  0x5f   : > { %2567 = dma.done.wait (%p57_p1), [#allocation14], 64  }
  0x60   : > { %2569 = vsyncadd (%p57_p1), [#allocation14], 4294967232 }
  0x61   : > { %2571 = dma.done.wait (%p57_p1), [#allocation17], 384  }
  0x62   : > { %2573 = vsyncadd (%p57_p1), [#allocation17], 4294966912 }
  0x63   : > { %2575 = dma.done.wait (%p57_p1), [#allocation20], 512  }
  0x64   : > { %2577 = vsyncadd (%p57_p1), [#allocation20], 4294966784  ;;  %v1946_v0 = vld [vmem:[#allocation4 + $0x8] sm:$0xff]  ;;  %v1945_v1 = vld [vmem:[#allocation4] sm:$0xff]  ;;  %vm756_vm0 = vcmask 261120   ;;  %s2611_s19 = smov 48  }
  0x65   : > { %v737_v2 = vld [vmem:[%s625_s29] sm:$0x1]  ;;  %766 = vmatpush.bf16.msra.mxu0 %v1946_v0  ;;  %v743_v4 = vld [vmem:[#allocation6] sm:$0x1]  ;;  %s2612_s12 = smov 80   ;;  %s3267_s14 = smov 112  }
  0x66   : > { %v738_v3 = vpack.c.bf16 %v737_v2, %v737_v2  ;;  %s2614_s20 = smov 32   ;;  %s2615_s30 = smov 64   ;;  %v1947_v24 = vld [vmem:[#allocation7] sm:$0xff]  ;;  %vm811_vm1 = vcmask 1040384   ;;  %vm813_vm2 = vcmask 1041408   ;;  %vm815_vm3 = vcmask 1042432  }
  0x67   : > { %s2616_s24 = smov 96   ;;  %s3265_s8 = smov 16   ;;  %845 = vmatpush.bf16.msra.mxu1 %v1947_v24  ;;  %vm817_vm4 = vcmask 1043456   ;;  %vm819_vm5 = vcmask 1044480   ;;  %vm821_vm6 = vcmask 1045504   ;;  %vm823_vm7 = vcmask 1046528  }
  0x68   : > { %vm834_vm8 = vcmask 130048   ;;  %s2618_s21 = smov 121   ;;  %s2619_s6 = smov 55   ;;  %vm935_vm9 = vcmask 449536   ;;  %v2932_v43 = vld [vmem:[#allocation18 + $0x8] ss:$0 sm:$0xff] }
  0x69   : > { %767 = vmatpush.bf16.msra.mxu0 %v1945_v1  ;;  %s2620_s27 = smov 119   ;;  %s2621_s23 = smov 56   ;;  %vm924_vm10 = vcmask 457728   ;;  %v2936_v50 = vld [vmem:[#allocation18 + $0x7] ss:$0 sm:$0xff]  ;;  %vm913_vm11 = vcmask 465920  }
  0x6a   : > { %s2622_s5 = smov 120   ;;  %s2623_s3 = smov 57   ;;  %v2939_v52 = vld [vmem:[#allocation18 + $0x6] ss:$0 sm:$0xff]  ;;  %vm902_vm12 = vcmask 515072   ;;  %vm891_vm13 = vcmask 7168  }
  0x6b   : > { %s2624_s22 = smov 71   ;;  %s2625_s28 = smov 63   ;;  %v2945_v61 = vld [vmem:[#allocation18 + $0x5] ss:$0 sm:$0xff]  ;;  %vm880_vm14 = vcmask 56320   ;;  %vm858_vm15 = vcmask 72704  }
  0x6c   : > { %1890 = vmatmul.msk.bf16.vlgmr.msra.gmra.mxu0 %vm756_vm0, %v738_v3  ;;  %s2626_s0 = smov 127   ;;  %s2627_s29 = smov 1   ;;  %v2634_v3 = vmov 0   ;;  %vm869_vm0 = vcmask 64512  }
  0x6d   : > { %2141 = vset.pattern.permute.xlu2 %v2634_v3  ;;  %2142 = vset.pattern.permute.xlu1 %v2634_v3  ;;  %p731_p1 = scmp.lt.s32.totalorder %s2753_s18, 1 }
  0x6e   : > { %2143 = vset.pattern.permute.xlu0 %v2634_v3 }
  0x6f   : > { %s3304_s18 = smov (!%p731_p1, %s2753_s18), 1 }
  0xe9   : > { %v769_v5 = vpop.f32.mrf.mxu0 }
  0xea   : > { %v770_v6 = vadd.f32 %v769_v5, %v743_v4  ;;  %v2953_v5 = vld [vmem:[#allocation18 + $0x3] ss:$0 sm:$0xff] }
  0xec   : > { %v774_v7 = vmul.f32 0.044715, %v770_v6  ;;  %v773_v14 = vmul.f32 0.5, %v770_v6 }
  0xee   : > { %v775_v8 = vmul.f32 %v774_v7, %v770_v6 }
  0xf0   : > { %v776_v9 = vmul.f32 %v775_v8, %v770_v6 }
  0xf1   : > { %v771_v10 = vpop.f32.mrf.mxu0 }
  0xf2   : > { %v777_v11 = vadd.f32 %v776_v9, %v770_v6  ;;  %v2955_v6 = vld [vmem:[#allocation18 + $0x2] ss:$0 sm:$0xff] }
  0xf4   : > { %v778_v12 = vmul.f32 0.7978846, %v777_v11 }
  0xf6   : > { %2152 = vtanh.f32 %v778_v12 }
  0xfc   : > { %v2153_v13 = vpop.eup %2152 }
  0xfd   : > { %v780_v15 = vadd.f32 1.0, %v2153_v13 }
  0xff   : > { %v781_v16 = vmul.f32 %v780_v15, %v773_v14 }
 0x101   : > { %v799_v17 = vrot.slane %v781_v16, 3  ;;  %v791_v18 = vrot.slane %v781_v16, 5  ;;  %v783_v19 = vrot.slane %v781_v16, 7  ;;  %v803_v20 = vrot.slane %v781_v16, 2 }
 0x102   : > { %v795_v21 = vrot.slane %v781_v16, 4  ;;  %v787_v22 = vrot.slane %v781_v16, 6  ;;  %v807_v23 = vrot.slane %v781_v16, 1 }
 0x103   : > { %800 = vrot.lane.b32.xlu2 %v799_v17, %s2611_s19  ;;  %792 = vrot.lane.b32.xlu1 %v791_v18, %s2612_s12  ;;  %s2628_s19 = smov 65   ;;  %s2629_s12 = smov 7   ;;  %v2961_v17 = vld [vmem:[#allocation18] ss:$0 sm:$0xff]  ;;  %v2963_v18 = vld [vmem:[#allocation18 + $0x1] ss:$0 sm:$0xff] }
 0x104   : > { %784 = vrot.lane.b32.xlu0 %v783_v19, %s3267_s14  ;;  %s3290_s14 = smov 73  }
 0x10b   : > { %804 = vrot.lane.b32.xlu2 %v803_v20, %s2614_s20  ;;  %796 = vrot.lane.b32.xlu1 %v795_v21, %s2615_s30  ;;  %s2630_s20 = smov 72   ;;  %s2631_s30 = smov 9  }
 0x10c   : > { %788 = vrot.lane.b32.xlu0 %v787_v22, %s2616_s24  ;;  %s3270_s24 = smov 73  }
 0x114   : > { %808 = vrot.lane.b32.xlu0 %v807_v23, %s3265_s8  ;;  %s3269_s8 = smov 8  }
 0x15d   : > { %v801_v27 = vpop.permute.xlu2 %800 }
 0x165   : > { %v805_v35 = vpop.permute.xlu2 %804 }
 0x175   : > { %v793_v25 = vpop.permute.xlu1 %792 }
 0x176   : > { %v785_v26 = vpop.permute.xlu0 %784 }
 0x177   : > { %v812_v28 = vsel %vm811_vm1, %v781_v16, %v785_v26  ;;  %v940_v26 = vld [vmem:[#allocation10] sm:$0xf]  ;;  %vm952_vm1 = vcmask 588800  }
 0x17d   : > { %v797_v31 = vpop.permute.xlu1 %796 }
 0x17e   : > { %v789_v29 = vpop.permute.xlu0 %788 }
 0x17f   : > { %v814_v30 = vsel %vm813_vm2, %v812_v28, %v789_v29 }
 0x180   : > { %v816_v32 = vsel %vm815_vm3, %v814_v30, %v793_v25  ;;  %vm1135_vm3 = vcmask 523264  }
 0x181   : > { %v818_v33 = vsel %vm817_vm4, %v816_v32, %v797_v31 }
 0x182   : > { %v820_v34 = vsel %vm819_vm5, %v818_v33, %v801_v27  ;;  %vm1301_vm5 = vcmask 908288  }
 0x183   : > { %v822_v36 = vsel %vm821_vm6, %v820_v34, %v805_v35  ;;  %vm1263_vm6 = vcmask 924672  }
 0x186   : > { %v809_v37 = vpop.permute.xlu0 %808 }
 0x187   : > { %v824_v38 = vsel %vm823_vm7, %v822_v36, %v809_v37  ;;  %vm1282_vm7 = vcmask 916480  }
 0x188   : > { %v825_v39 = vpack.c.bf16 %v824_v38, %v824_v38 }
 0x18a   : > { %1895 = vmatmul.msk.bf16.vlgmr.msra.gmra.mxu1 %vm834_vm8, %v825_v39 }
 0x207   : > { %v2898_v40 = vpop.f32.mrf.mxu1 }
 0x208   : > { %907 = vrot.lane.b32.xlu0 %v2898_v40, %s2618_s21  ;;  %932 = vrot.lane.b32.xlu2 %v2898_v40, %s2619_s6 }
 0x209   : > { %929 = vrot.lane.b32.xlu1 %v2898_v40, %s2620_s27 }
 0x20f   : > { %v849_v41 = vpop.f32.mrf.mxu1 }
 0x210   : > { %921 = vrot.lane.b32.xlu0 %v2898_v40, %s2621_s23  ;;  %918 = vrot.lane.b32.xlu2 %v2898_v40, %s2622_s5 }
 0x211   : > { %910 = vrot.lane.b32.xlu1 %v2898_v40, %s2623_s3 }
 0x218   : > { %874 = vrot.lane.b32.xlu0 %v2898_v40, %s2624_s22  ;;  %899 = vrot.lane.b32.xlu2 %v2898_v40, %s2625_s28 }
 0x219   : > { %896 = vrot.lane.b32.xlu1 %v2898_v40, %s2626_s0 }
 0x220   : > { %888 = vrot.lane.b32.xlu0 %v2898_v40, %s2627_s29  ;;  %885 = vrot.lane.b32.xlu2 %v2898_v40, %s2628_s19 }
 0x221   : > { %877 = vrot.lane.b32.xlu1 %v2898_v40, %s2629_s12 }
 0x228   : > { %863 = vrot.lane.b32.xlu0 %v2898_v40, %s2630_s20  ;;  %855 = vrot.lane.b32.xlu2 %v2898_v40, %s2631_s30 }
 0x229   : > { %852 = vrot.lane.b32.xlu1 %v2898_v40, %s3270_s24  ;;  %s3289_s24 = sld [smem:[#allocation32_spill]] }
 0x22f   : > { %v946_v1 = vld [vmem:[%s3289_s24] sm:$0xff] }
 0x230   : > { %949 = vperm.xlu2 %2141, %v946_v1  }
 0x231   : > { %866 = vrot.lane.b32.xlu1 %v2898_v40, %s3269_s8  ;;  %s3291_s8 = smov 8  }
 0x262   : > { %v933_v42 = vpop.permute.xlu2 %932 }
 0x26a   : > { %v919_v48 = vpop.permute.xlu2 %918 }
 0x272   : > { %v900_v60 = vpop.permute.xlu2 %899 }
 0x27a   : > { %v908_v44 = vpop.permute.xlu0 %907  ;;  %v886_v7 = vpop.permute.xlu2 %885 }
 0x27b   : > { %v930_v45 = vpop.permute.xlu1 %929 }
 0x27c   : > { %v936_v46 = vsel %vm935_vm9, %v930_v45, %v933_v42 }
 0x27d   : > { %v939_v47 = vmul.f32 %v2932_v43, %v936_v46 }
 0x27f   : > { %v945_v49 = vpack.c.bf16 %v939_v47, %v939_v47 }
 0x281   : > { %v957_v51 = vsel %vm817_vm4, %v945_v49, 0 }
 0x282   : > { %962 = vmatpush.bf16.msra.mxu2 %v957_v51  ;;  %v922_v53 = vpop.permute.xlu0 %921  ;;  %v856_v16 = vpop.permute.xlu2 %855 }
 0x283   : > { %v925_v54 = vsel %vm924_vm10, %v919_v48, %v922_v53  ;;  %v911_v55 = vpop.permute.xlu1 %910 }
 0x284   : > { %v928_v56 = vmul.f32 %v2936_v50, %v925_v54  ;;  %v914_v57 = vsel %vm913_vm11, %v908_v44, %v911_v55 }
 0x285   : > { %v917_v58 = vmul.f32 %v2939_v52, %v914_v57 }
 0x287   : > { %v944_v59 = vpack.c.bf16 %v928_v56, %v917_v58 }
 0x289   : > { %963 = vmatpush.bf16.msra.mxu2 %v944_v59 }
 0x28a   : > { %v875_v62 = vpop.permute.xlu0 %874  ;;  %v950_v27 = vpop.permute.xlu2 %949 }
 0x28b   : > { %v897_v63 = vpop.permute.xlu1 %896 }
 0x28c   : > { %v903_v0 = vsel %vm902_vm12, %v897_v63, %v900_v60 }
 0x28d   : > { %v906_v2 = vmul.f32 %v2945_v61, %v903_v0 }
 0x28f   : > { %v943_v4 = vpack.c.bf16 %v906_v2, %v2898_v40 }
 0x291   : > { %964 = vmatpush.bf16.msra.mxu2 %v943_v4 }
 0x292   : > { %v889_v8 = vpop.permute.xlu0 %888 }
 0x293   : > { %v892_v9 = vsel %vm891_vm13, %v886_v7, %v889_v8  ;;  %v878_v10 = vpop.permute.xlu1 %877 }
 0x294   : > { %v895_v11 = vmul.f32 %v2953_v5, %v892_v9  ;;  %v881_v12 = vsel %vm880_vm14, %v875_v62, %v878_v10 }
 0x295   : > { %v884_v13 = vmul.f32 %v2955_v6, %v881_v12 }
 0x297   : > { %v942_v14 = vpack.c.bf16 %v895_v11, %v884_v13 }
 0x299   : > { %965 = vmatpush.bf16.msra.mxu2 %v942_v14 }
 0x29a   : > { %v864_v20 = vpop.permute.xlu0 %863 }
 0x29b   : > { %v853_v15 = vpop.permute.xlu1 %852 }
 0x29c   : > { %v859_v19 = vsel %vm858_vm15, %v853_v15, %v856_v16 }
 0x29d   : > { %v862_v23 = vmul.f32 %v2961_v17, %v859_v19  ;;  %v1955_v19 = vld [vmem:[#allocation9 + $0x34] sm:$0xf0] }
 0x2a3   : > { %v867_v21 = vpop.permute.xlu1 %866 }
 0x2a4   : > { %v870_v22 = vsel %vm869_vm0, %v864_v20, %v867_v21  ;;  %v1954_v20 = vld [vmem:[#allocation9 + $0x34] sm:$0xf] }
 0x2a5   : > { %v873_v24 = vmul.f32 %v2963_v18, %v870_v22  ;;  %v1926_v22 = vld [vmem:[#allocation9 + $0x38] sm:$0xf0] }
 0x2a7   : > { %v941_v25 = vpack.c.bf16 %v873_v24, %v862_v23  ;;  %v1916_v23 = vld [vmem:[#allocation9 + $0x20] sm:$0xf]  ;;  %v1953_v24 = vld [vmem:[#allocation9 + $0x24] sm:$0xf0] }
 0x2a9   : > { %966 = vmatpush.bf16.msra.mxu2 %v941_v25  ;;  %v1929_v25 = vor.u32 %v1954_v20, %v1926_v22 }
 0x2ab   : > { %1156 = vmatpush.bf16.msrb.mxu0 %v1929_v25 }
 0x2ac   : > { %1896 = vmatmul.msk.bf16.vlgmr.msra.gmra.mxu2 %vm952_vm1, %v940_v26  ;;  %v1952_v26 = vld [vmem:[#allocation9 + $0x24] sm:$0xf] }
 0x32f   : > { %v968_v28 = vpop.f32.mrf.mxu2 }
 0x330   : > { %v969_v29 = vadd.f32 %v968_v28, %v950_v27  ;;  %v1918_v27 = vld [vmem:[#allocation9 + $0x28] sm:$0xf0]  ;;  %v1917_v28 = vor.u32 %v1953_v24, %v1916_v23 }
 0x332   : > { %v973_v30 = vmul.f32 0.044715, %v969_v29  ;;  %v972_v37 = vmul.f32 0.5, %v969_v29 }
 0x334   : > { %v974_v31 = vmul.f32 %v973_v30, %v969_v29  ;;  %v1950_v30 = vld [vmem:[#allocation9 + $0x14] sm:$0xf] }
 0x336   : > { %v975_v32 = vmul.f32 %v974_v31, %v969_v29  ;;  %v1910_v31 = vld [vmem:[#allocation9 + $0x18] sm:$0xf0] }
 0x337   : > { %v970_v33 = vpop.f32.mrf.mxu2 }
 0x338   : > { %v976_v34 = vadd.f32 %v975_v32, %v969_v29  ;;  %v1951_v29 = vld [vmem:[#allocation9 + $0x14] sm:$0xf0]  ;;  %v1913_v33 = vor.u32 %v1950_v30, %v1910_v31 }
 0x33a   : > { %v977_v35 = vmul.f32 0.7978846, %v976_v34  ;;  %v1900_v34 = vld [vmem:[#allocation9] sm:$0xf] }
 0x33c   : > { %2154 = vtanh.f32 %v977_v35  ;;  %v1949_v35 = vld [vmem:[#allocation9 + $0x4] sm:$0xf0] }
 0x342   : > { %v2155_v36 = vpop.eup %2154 }
 0x343   : > { %v979_v38 = vadd.f32 1.0, %v2155_v36  ;;  %v1948_v36 = vld [vmem:[#allocation9 + $0x4] sm:$0xf] }
 0x345   : > { %v980_v39 = vmul.f32 %v979_v38, %v972_v37  ;;  %v1902_v37 = vld [vmem:[#allocation9 + $0x8] sm:$0xf0]  ;;  %v1901_v38 = vor.u32 %v1949_v35, %v1900_v34 }
 0x347   : > { %1022 = vrot.lane.b32.xlu2 %v980_v39, %s2618_s21  ;;  %1041 = vrot.lane.b32.xlu1 %v980_v39, %s2619_s6  ;;  %s3297_s6 = sld [smem:[#allocation36_spill]] }
 0x348   : > { %1038 = vrot.lane.b32.xlu0 %v980_v39, %s2620_s27  ;;  %s3292_s27 = sld [smem:[#allocation33_spill]] }
 0x34e   : > { %v1052_v62 = vld [vmem:[%s3292_s27] sm:$0xff] }
 0x34f   : > { %1033 = vrot.lane.b32.xlu2 %v980_v39, %s2621_s23  ;;  %1030 = vrot.lane.b32.xlu1 %v980_v39, %s2622_s5  ;;  %s2635_s23 = smov 111   ;;  %s2636_s5 = smov 113  }
 0x350   : > { %1025 = vrot.lane.b32.xlu0 %v980_v39, %s2623_s3  ;;  %s3293_s3 = smov 112  }
 0x357   : > { %998 = vrot.lane.b32.xlu2 %v980_v39, %s2624_s22  ;;  %1017 = vrot.lane.b32.xlu1 %v980_v39, %s2625_s28  ;;  %s2637_s22 = smov 15   ;;  %s2638_s28 = smov 17  }
 0x358   : > { %1014 = vrot.lane.b32.xlu0 %v980_v39, %s2626_s0 }
 0x35f   : > { %1009 = vrot.lane.b32.xlu2 %v980_v39, %s2627_s29  ;;  %1006 = vrot.lane.b32.xlu1 %v980_v39, %s2628_s19  ;;  %s3294_s19 = smov 16  }
 0x360   : > { %1001 = vrot.lane.b32.xlu0 %v980_v39, %s2629_s12 }
 0x367   : > { %990 = vrot.lane.b32.xlu2 %v980_v39, %s2630_s20  ;;  %985 = vrot.lane.b32.xlu1 %v980_v39, %s2631_s30  ;;  %s3295_s30 = sld [smem:[#allocation34_spill]] }
 0x368   : > { %982 = vrot.lane.b32.xlu0 %v980_v39, %s3290_s14 }
 0x36d   : > { %v1327_v24 = vld [vmem:[%s3295_s30] sm:$0xf] }
 0x36f   : > { %1055 = vperm.xlu1 %2142, %v1052_v62  }
 0x370   : > { %993 = vrot.lane.b32.xlu0 %v980_v39, %s3291_s8  ;;  %s3296_s8 = sld [smem:[#allocation35_spill]] }
 0x3a1   : > { %v1023_v40 = vpop.permute.xlu2 %1022 }
 0x3a9   : > { %v1034_v46 = vpop.permute.xlu2 %1033 }
 0x3b1   : > { %v999_v58 = vpop.permute.xlu2 %998 }
 0x3b9   : > { %v1042_v41 = vpop.permute.xlu1 %1041 }
 0x3ba   : > { %v1039_v42 = vpop.permute.xlu0 %1038 }
 0x3bb   : > { %v1044_v44 = vsel %vm935_vm9, %v1039_v42, %v1042_v41  ;;  %vm1244_vm9 = vcmask 1039360  }
 0x3bc   : > { %v1045_v45 = vmul.f32 %v2932_v43, %v1044_v44 }
 0x3be   : > { %v1051_v47 = vpack.c.bf16 %v1045_v45, %v1045_v45 }
 0x3c0   : > { %v1062_v48 = vsel %vm817_vm4, %v1051_v47, 0 }
 0x3c1   : > { %1067 = vmatpush.bf16.msra.mxu3 %v1062_v48  ;;  %v1031_v49 = vpop.permute.xlu1 %1030 }
 0x3c2   : > { %v1036_v51 = vsel %vm924_vm10, %v1031_v49, %v1034_v46  ;;  %v1026_v53 = vpop.permute.xlu0 %1025  ;;  %vm1208_vm10 = vcmask 121856  }
 0x3c3   : > { %v1037_v54 = vmul.f32 %v2936_v50, %v1036_v51  ;;  %v1028_v55 = vsel %vm913_vm11, %v1023_v40, %v1026_v53  ;;  %v1010_v50 = vpop.permute.xlu2 %1009  ;;  %vm1172_vm11 = vcmask 138240  }
 0x3c4   : > { %v1029_v56 = vmul.f32 %v2939_v52, %v1028_v55 }
 0x3c6   : > { %v1050_v57 = vpack.c.bf16 %v1037_v54, %v1029_v56 }
 0x3c8   : > { %1068 = vmatpush.bf16.msra.mxu3 %v1050_v57 }
 0x3c9   : > { %v1018_v59 = vpop.permute.xlu1 %1017 }
 0x3ca   : > { %v1015_v43 = vpop.permute.xlu0 %1014 }
 0x3cb   : > { %v1020_v60 = vsel %vm902_vm12, %v1015_v43, %v1018_v59  ;;  %v991_v11 = vpop.permute.xlu2 %990 }
 0x3cc   : > { %v1021_v63 = vmul.f32 %v2945_v61, %v1020_v60 }
 0x3ce   : > { %v1049_v0 = vpack.c.bf16 %v1021_v63, %v980_v39  ;;  %v1905_v39 = vor.u32 %v1948_v36, %v1902_v37  ;;  %v1308_v63 = vld [vmem:[#allocation19 + $0x10] ss:$8 sm:$0x3] }
 0x3d0   : > { %1069 = vmatpush.bf16.msra.mxu3 %v1049_v0  ;;  %v3043_v0 = vperm.slane %v1308_v63, 0 }
 0x3d1   : > { %v1007_v1 = vpop.permute.xlu1 %1006 }
 0x3d2   : > { %v1012_v52 = vsel %vm891_vm13, %v1007_v1, %v1010_v50  ;;  %v1002_v2 = vpop.permute.xlu0 %1001  ;;  %v3045_v50 = vperm.slane %v1308_v63, 1 }
 0x3d3   : > { %v1013_v3 = vmul.f32 %v2953_v5, %v1012_v52  ;;  %v1004_v4 = vsel %vm880_vm14, %v999_v58, %v1002_v2  ;;  %v1046_v5 = vld [vmem:[#allocation12] sm:$0xf] }
 0x3d4   : > { %v1005_v7 = vmul.f32 %v2955_v6, %v1004_v4  ;;  %v1924_v6 = vld [vmem:[#allocation9 + $0x30] sm:$0xf] }
 0x3d5   : > { %v1925_v21 = vor.u32 %v1955_v19, %v1924_v6 }
 0x3d6   : > { %v1048_v8 = vpack.c.bf16 %v1013_v3, %v1005_v7 }
 0x3d7   : > { %1143 = vmatpush.bf16.msrb.mxu1 %v1925_v21 }
 0x3d8   : > { %1070 = vmatpush.bf16.msra.mxu3 %v1048_v8 }
 0x3d9   : > { %v986_v10 = vpop.permute.xlu1 %985 }
 0x3da   : > { %v983_v9 = vpop.permute.xlu0 %982 }
 0x3db   : > { %v988_v61 = vsel %vm858_vm15, %v983_v9, %v986_v10  ;;  %1144 = vmatpush.bf16.msrb.mxu1 %v1917_v28  ;;  %v3051_v9 = vld [vmem:[#allocation19 + $0x6] ss:$8 sm:$0x3]  ;;  %v1289_v10 = vld [vmem:[#allocation19 + $0x7] ss:$8 sm:$0x3] }
 0x3dc   : > { %v989_v14 = vmul.f32 %v2961_v17, %v988_v61  ;;  %v1921_v17 = vor.u32 %v1952_v26, %v1918_v27 }
 0x3de   : > { %1157 = vmatpush.bf16.msrb.mxu0 %v1921_v17 }
 0x3e1   : > { %v1056_v40 = vpop.permute.xlu1 %1055 }
 0x3e2   : > { %v994_v12 = vpop.permute.xlu0 %993  ;;  %1158 = vmatpush.bf16.msrb.mxu0 %v1913_v33 }
 0x3e3   : > { %v996_v13 = vsel %vm869_vm0, %v991_v11, %v994_v12  ;;  %v1272_v12 = vperm.slane %v3051_v9, 0 }
 0x3e4   : > { %v997_v15 = vmul.f32 %v2963_v18, %v996_v13  ;;  %v1908_v18 = vld [vmem:[#allocation9 + $0x10] sm:$0xf]  ;;  %v1273_v13 = vperm.slane %v3051_v9, 1 }
 0x3e5   : > { %v1909_v32 = vor.u32 %v1951_v29, %v1908_v18  ;;  %v1251_v18 = vld [vmem:[#allocation19 + $0x5] ss:$8 sm:$0x3] }
 0x3e6   : > { %v1047_v16 = vpack.c.bf16 %v997_v15, %v989_v14  ;;  %1159 = vmatpush.bf16.msrb.mxu0 %v1905_v39  ;;  %v3074_v31 = vperm.slane %v1251_v18, 0  ;;  %v3082_v39 = vld [vmem:[#allocation19 + $0x2] ss:$8 sm:$0x3] }
 0x3e7   : > { %1145 = vmatpush.bf16.msrb.mxu1 %v1909_v32  ;;  %v3076_v32 = vperm.slane %v1251_v18, 1 }
 0x3e8   : > { %1071 = vmatpush.bf16.msra.mxu3 %v1047_v16  ;;  %v3057_v16 = vperm.slane %v1289_v10, 0 }
 0x3eb   : > { %1897 = vmatmul.msk.bf16.vlgmr.msra.gmra.mxu3 %vm952_vm1, %v1046_v5  ;;  %1146 = vmatpush.bf16.msrb.mxu1 %v1901_v38  ;;  %v3059_v5 = vperm.slane %v1289_v10, 1 }
 0x46e   : > { %v1073_v41 = vpop.f32.mrf.mxu3 }
 0x46f   : > { %v1074_v42 = vadd.f32 %v1073_v41, %v1056_v40  ;;  %v3084_v40 = vld [vmem:[#allocation19 + $0x3] ss:$8 sm:$0x3] }
 0x471   : > { %v1078_v44 = vmul.f32 0.044715, %v1074_v42  ;;  %v1077_v53 = vmul.f32 0.5, %v1074_v42 }
 0x473   : > { %v1079_v45 = vmul.f32 %v1078_v44, %v1074_v42 }
 0x475   : > { %v1080_v46 = vmul.f32 %v1079_v45, %v1074_v42  ;;  %v1216_v45 = vperm.slane %v3082_v39, 0 }
 0x476   : > { %v1075_v47 = vpop.f32.mrf.mxu3 }
 0x477   : > { %v1081_v48 = vadd.f32 %v1080_v46, %v1074_v42  ;;  %v1217_v46 = vperm.slane %v3082_v39, 1  ;;  %v1234_v47 = vperm.slane %v3084_v40, 0 }
 0x479   : > { %v1082_v49 = vmul.f32 0.7978846, %v1081_v48  ;;  %v1235_v48 = vperm.slane %v3084_v40, 1 }
 0x47b   : > { %2156 = vtanh.f32 %v1082_v49 }
 0x481   : > { %v2157_v51 = vpop.eup %2156 }
 0x482   : > { %v1084_v54 = vadd.f32 1.0, %v2157_v51 }
 0x484   : > { %v1085_v55 = vmul.f32 %v1084_v54, %v1077_v53 }
 0x486   : > { %v1086_v56 = vpack.c.bf16 %v1085_v55, %v1085_v55 }
 0x488   : > { %1930 = vmatmul.msk.bf16.vlgmr.msrb.gmra.mxu1 %vm1135_vm3, %v1086_v56  ;;  %1931 = vmatmul.msk.bf16.vlgmr.msrb.gmra.mxu0 %vm1135_vm3, %v1086_v56 }
 0x505   : > { %v3007_v57 = vpop.f32.mrf.mxu1  ;;  %v3009_v58 = vpop.f32.mrf.mxu0 }
 0x506   : > { %1299 = vrot.lane.b32.xlu0 %v3009_v58, %s2635_s23  ;;  %1259 = vrot.lane.b32.xlu1 %v3007_v57, %s2636_s5 }
 0x507   : > { %1297 = vrot.lane.b32.xlu2 %v3007_v57, %s2635_s23 }
 0x50d   : > { %v1150_v59 = vpop.f32.mrf.mxu1  ;;  %v1163_v43 = vpop.f32.mrf.mxu0 }
 0x50e   : > { %1278 = vrot.lane.b32.xlu0 %v3007_v57, %s3293_s3  ;;  %1280 = vrot.lane.b32.xlu1 %v3009_v58, %s3293_s3 }
 0x50f   : > { %1261 = vrot.lane.b32.xlu2 %v3009_v58, %s2636_s5 }
 0x516   : > { %1242 = vrot.lane.b32.xlu0 %v3009_v58, %s2626_s0  ;;  %1203 = vrot.lane.b32.xlu1 %v3009_v58, %s2637_s22 }
 0x517   : > { %1240 = vrot.lane.b32.xlu2 %v3007_v57, %s2626_s0 }
 0x51e   : > { %1222 = vrot.lane.b32.xlu0 %v3009_v58, %s2627_s29  ;;  %1225 = vrot.lane.b32.xlu1 %v3007_v57, %s2627_s29 }
 0x51f   : > { %1206 = vrot.lane.b32.xlu2 %v3007_v57, %s2637_s22 }
 0x526   : > { %1170 = vrot.lane.b32.xlu0 %v3007_v57, %s2638_s28  ;;  %1185 = vrot.lane.b32.xlu1 %v3009_v58, %s3294_s19 }
 0x527   : > { %1166 = vrot.lane.b32.xlu2 %v3009_v58, %s2638_s28 }
 0x52e   : > { %1330 = vperm.xlu0 %2143, %v1327_v24   ;;  %v1316_v24 = vld [vmem:[#allocation13] sm:$0x3] }
 0x52f   : > { %1188 = vrot.lane.b32.xlu2 %v3007_v57, %s3294_s19 }
 0x561   : > { %v1298_v60 = vpop.permute.xlu2 %1297 }
 0x569   : > { %v1262_v62 = vpop.permute.xlu2 %1261 }
 0x571   : > { %v1241_v2 = vpop.permute.xlu2 %1240 }
 0x578   : > { %v1300_v1 = vpop.permute.xlu0 %1299  ;;  %v1260_v52 = vpop.permute.xlu1 %1259 }
 0x579   : > { %v1302_v3 = vsel %vm1301_vm5, %v1298_v60, %v1300_v1  ;;  %v1306_v4 = vsel %vm1301_vm5, %v1300_v1, %v1298_v60  ;;  %v1264_v6 = vsel %vm1263_vm6, %v1260_v52, %v1262_v62  ;;  %v1268_v19 = vsel %vm1263_vm6, %v1262_v62, %v1260_v52  ;;  %v1207_v17 = vpop.permute.xlu2 %1206  ;;  %v3104_v60 = vld [vmem:[#allocation19] ss:$8 sm:$0x3]  ;;  %v3106_v62 = vld [vmem:[#allocation19 + $0x1] ss:$8 sm:$0x3] }
 0x57a   : > { %v1314_v7 = vmul.f32 %v3043_v0, %v1302_v3  ;;  %v1315_v8 = vmul.f32 %v3045_v50, %v1306_v4  ;;  %v1276_v25 = vmul.f32 %v1272_v12, %v1264_v6  ;;  %v1277_v26 = vmul.f32 %v1273_v13, %v1268_v19 }
 0x57b   : > { %v1179_v52 = vperm.slane %v3104_v60, 0  ;;  %v1197_v3 = vperm.slane %v3106_v62, 0  ;;  %v1198_v4 = vperm.slane %v3106_v62, 1 }
 0x57c   : > { %v1325_v61 = vpack.c.bf16 %v1314_v7, %v1314_v7  ;;  %v1326_v11 = vpack.c.bf16 %v1315_v8, %v1315_v8 }
 0x57e   : > { %v1337_v14 = vsel %vm817_vm4, %v1325_v61, 0  ;;  %v1340_v15 = vsel %vm817_vm4, %v1326_v11, 0 }
 0x57f   : > { %1345 = vmatpush.bf16.msra.mxu1 %v1337_v14  ;;  %1358 = vmatpush.bf16.msrb.mxu2 %v1340_v15 }
 0x580   : > { %v1279_v20 = vpop.permute.xlu0 %1278  ;;  %v1281_v21 = vpop.permute.xlu1 %1280 }
 0x581   : > { %v1283_v22 = vsel %vm1282_vm7, %v1279_v20, %v1281_v21  ;;  %v1287_v23 = vsel %vm1282_vm7, %v1281_v21, %v1279_v20  ;;  %v1167_v44 = vpop.permute.xlu2 %1166 }
 0x582   : > { %v1295_v27 = vmul.f32 %v3057_v16, %v1283_v22  ;;  %v1296_v28 = vmul.f32 %v3059_v5, %v1287_v23 }
 0x584   : > { %v1323_v29 = vpack.c.bf16 %v1295_v27, %v1276_v25  ;;  %v1324_v30 = vpack.c.bf16 %v1296_v28, %v1277_v26 }
 0x586   : > { %1346 = vmatpush.bf16.msra.mxu1 %v1323_v29  ;;  %1359 = vmatpush.bf16.msrb.mxu2 %v1324_v30 }
 0x588   : > { %v1243_v33 = vpop.permute.xlu0 %1242  ;;  %v1204_v34 = vpop.permute.xlu1 %1203 }
 0x589   : > { %v1245_v35 = vsel %vm1244_vm9, %v1241_v2, %v1243_v33  ;;  %v1249_v36 = vsel %vm1244_vm9, %v1243_v33, %v1241_v2  ;;  %v1209_v49 = vsel %vm1208_vm10, %v1207_v17, %v1204_v34  ;;  %v1212_v51 = vsel %vm1208_vm10, %v1204_v34, %v1207_v17  ;;  %v1189_v7 = vpop.permute.xlu2 %1188 }
 0x58a   : > { %v1257_v37 = vmul.f32 %v3074_v31, %v1245_v35  ;;  %v1258_v38 = vmul.f32 %v3076_v32, %v1249_v36  ;;  %v1180_v2 = vperm.slane %v3104_v60, 1  ;;  %v1508_v60 = vld [vmem:[#allocation15] sm:$0x3] }
 0x58c   : > { %v1321_v41 = vpack.c.bf16 %v1257_v37, %v3007_v57  ;;  %v1322_v42 = vpack.c.bf16 %v1258_v38, %v3009_v58  ;;  %v1220_v57 = vmul.f32 %v1216_v45, %v1212_v51  ;;  %v1221_v58 = vmul.f32 %v1217_v46, %v1209_v49 }
 0x58e   : > { %1347 = vmatpush.bf16.msra.mxu1 %v1321_v41  ;;  %1360 = vmatpush.bf16.msrb.mxu2 %v1322_v42 }
 0x590   : > { %v1223_v53 = vpop.permute.xlu0 %1222  ;;  %v1226_v54 = vpop.permute.xlu1 %1225 }
 0x591   : > { %v1227_v55 = vsel %vm891_vm13, %v1226_v54, %v1223_v53  ;;  %v1230_v56 = vsel %vm891_vm13, %v1223_v53, %v1226_v54 }
 0x592   : > { %v1238_v59 = vmul.f32 %v1234_v47, %v1230_v56  ;;  %v1239_v43 = vmul.f32 %v1235_v48, %v1227_v55 }
 0x594   : > { %v1319_v63 = vpack.c.bf16 %v1238_v59, %v1220_v57  ;;  %v1320_v1 = vpack.c.bf16 %v1239_v43, %v1221_v58  ;;  %v1515_v59 = vld [vmem:[%s3296_s8] sm:$0xf] }
 0x596   : > { %1348 = vmatpush.bf16.msra.mxu1 %v1319_v63  ;;  %1361 = vmatpush.bf16.msrb.mxu2 %v1320_v1 }
 0x598   : > { %v1171_v8 = vpop.permute.xlu0 %1170  ;;  %v1186_v10 = vpop.permute.xlu1 %1185 }
 0x599   : > { %v1173_v61 = vsel %vm1172_vm11, %v1171_v8, %v1167_v44  ;;  %v1176_v11 = vsel %vm1172_vm11, %v1167_v44, %v1171_v8  ;;  %v1190_v14 = vsel %vm834_vm8, %v1189_v7, %v1186_v10  ;;  %v1193_v15 = vsel %vm834_vm8, %v1186_v10, %v1189_v7 }
 0x59a   : > { %v1183_v6 = vmul.f32 %v1179_v52, %v1176_v11  ;;  %v1184_v19 = vmul.f32 %v1180_v2, %v1173_v61  ;;  %v1201_v20 = vmul.f32 %v1197_v3, %v1193_v15  ;;  %v1202_v21 = vmul.f32 %v1198_v4, %v1190_v14 }
 0x59c   : > { %v1317_v22 = vpack.c.bf16 %v1201_v20, %v1183_v6  ;;  %v1318_v23 = vpack.c.bf16 %v1202_v21, %v1184_v19 }
 0x59e   : > { %1349 = vmatpush.bf16.msra.mxu1 %v1317_v22  ;;  %1362 = vmatpush.bf16.msrb.mxu2 %v1318_v23 }
 0x5a0   : > { %v1331_v25 = vpop.permute.xlu0 %1330 }
 0x5a1   : > { %1932 = vmatmul.msk.bf16.vlgmr.msra.gmra.mxu1 %vm952_vm1, %v1316_v24  ;;  %1933 = vmatmul.msk.bf16.vlgmr.msrb.gmra.mxu2 %vm952_vm1, %v1316_v24 }
 0x61e   : > { %v1351_v26 = vpop.f32.mrf.mxu1 }
 0x61f   : > { %v1352_v27 = vadd.f32 %v1351_v26, %v1331_v25 }
 0x621   : > { %v1370_v28 = vmul.f32 0.044715, %v1352_v27  ;;  %v1368_v51 = vmul.f32 0.5, %v1352_v27 }
 0x623   : > { %v1372_v17 = vmul.f32 %v1370_v28, %v1352_v27 }
 0x624   : > { %v1364_v18 = vpop.f32.mrf.mxu2 }
 0x625   : > { %v1374_v29 = vmul.f32 %v1372_v17, %v1352_v27  ;;  %v1365_v30 = vadd.f32 %v1364_v18, %v1331_v25 }
 0x626   : > { %v1353_v33 = vpop.f32.mrf.mxu1 }
 0x627   : > { %v1376_v34 = vadd.f32 %v1374_v29, %v1352_v27  ;;  %v1371_v35 = vmul.f32 0.044715, %v1365_v30  ;;  %v1369_v57 = vmul.f32 0.5, %v1365_v30 }
 0x629   : > { %v1378_v36 = vmul.f32 0.7978846, %v1376_v34  ;;  %v1373_v37 = vmul.f32 %v1371_v35, %v1365_v30 }
 0x62b   : > { %2158 = vtanh.f32 %v1378_v36  ;;  %v1375_v38 = vmul.f32 %v1373_v37, %v1365_v30 }
 0x62c   : > { %v1366_v41 = vpop.f32.mrf.mxu2 }
 0x62d   : > { %v1377_v42 = vadd.f32 %v1375_v38, %v1365_v30 }
 0x62f   : > { %v1379_v44 = vmul.f32 0.7978846, %v1377_v42 }
 0x631   : > { %v2159_v49 = vpop.eup %2158  ;;  %2160 = vtanh.f32 %v1379_v44 }
 0x632   : > { %v1382_v53 = vadd.f32 1.0, %v2159_v49 }
 0x634   : > { %v1384_v54 = vmul.f32 %v1382_v53, %v1368_v51 }
 0x636   : > { %1443 = vrot.lane.b32.xlu2 %v1384_v54, %s2636_s5  ;;  %1454 = vrot.lane.b32.xlu0 %v1384_v54, %s3293_s3 }
 0x637   : > { %v2161_v55 = vpop.eup %2160  ;;  %1465 = vrot.lane.b32.xlu1 %v1384_v54, %s2635_s23 }
 0x638   : > { %v1383_v56 = vadd.f32 1.0, %v2161_v55 }
 0x63a   : > { %v1385_v58 = vmul.f32 %v1383_v56, %v1369_v57 }
 0x63e   : > { %1402 = vrot.lane.b32.xlu2 %v1384_v54, %s3294_s19  ;;  %1445 = vrot.lane.b32.xlu0 %v1385_v58, %s2636_s5 }
 0x63f   : > { %1432 = vrot.lane.b32.xlu1 %v1384_v54, %s2626_s0 }
 0x646   : > { %1467 = vrot.lane.b32.xlu2 %v1385_v58, %s2635_s23  ;;  %1421 = vrot.lane.b32.xlu0 %v1385_v58, %s2627_s29 }
 0x647   : > { %1424 = vrot.lane.b32.xlu1 %v1384_v54, %s2627_s29 }
 0x64e   : > { %1434 = vrot.lane.b32.xlu2 %v1385_v58, %s2626_s0  ;;  %1391 = vrot.lane.b32.xlu0 %v1384_v54, %s2638_s28 }
 0x64f   : > { %1456 = vrot.lane.b32.xlu1 %v1385_v58, %s3293_s3 }
 0x656   : > { %1387 = vrot.lane.b32.xlu2 %v1385_v58, %s2638_s28  ;;  %1518 = vperm.xlu0 %2143, %v1515_v59  }
 0x657   : > { %1399 = vrot.lane.b32.xlu1 %v1385_v58, %s3294_s19 }
 0x65e   : > { %1413 = vrot.lane.b32.xlu2 %v1384_v54, %s2637_s22 }
 0x65f   : > { %1410 = vrot.lane.b32.xlu1 %v1385_v58, %s2637_s22  ;;  %s3298_s22 = sld [smem:[#allocation37_spill]] }
 0x690   : > { %v1444_v43 = vpop.permute.xlu2 %1443 }
 0x698   : > { %v1403_v63 = vpop.permute.xlu2 %1402 }
 0x6a0   : > { %v1468_v1 = vpop.permute.xlu2 %1467 }
 0x6a8   : > { %v1455_v6 = vpop.permute.xlu0 %1454  ;;  %v1435_v24 = vpop.permute.xlu2 %1434 }
 0x6a9   : > { %v1466_v7 = vpop.permute.xlu1 %1465 }
 0x6aa   : > { %v1469_v8 = vsel %vm1301_vm5, %v1466_v7, %v1468_v1  ;;  %v1473_v10 = vsel %vm1301_vm5, %v1468_v1, %v1466_v7 }
 0x6ab   : > { %v1474_v61 = vmul.f32 %v1469_v8, %v3043_v0  ;;  %v1475_v11 = vmul.f32 %v1473_v10, %v3045_v50 }
 0x6ad   : > { %v1514_v14 = vpack.c.bf16 %v1475_v11, %v1475_v11  ;;  %v1513_v15 = vpack.c.bf16 %v1474_v61, %v1474_v61 }
 0x6af   : > { %v1526_v19 = vsel %vm813_vm2, %v1513_v15, 0  ;;  %v1529_v20 = vsel %vm813_vm2, %v1514_v14, 0  ;;  %vm1521_vm2 = vcmask 293888  }
 0x6b0   : > { %1536 = vmatpush.bf16.msrb.mxu3 %v1526_v19  ;;  %1549 = vmatpush.bf16.msra.mxu0 %v1529_v20  ;;  %v1446_v22 = vpop.permute.xlu0 %1445  ;;  %v1388_v51 = vpop.permute.xlu2 %1387 }
 0x6b1   : > { %v1433_v21 = vpop.permute.xlu1 %1432  ;;  %v1447_v18 = vsel %vm1263_vm6, %v1444_v43, %v1446_v22  ;;  %v1451_v29 = vsel %vm1263_vm6, %v1446_v22, %v1444_v43 }
 0x6b2   : > { %v1436_v25 = vsel %vm1244_vm9, %v1433_v21, %v1435_v24  ;;  %v1440_v26 = vsel %vm1244_vm9, %v1435_v24, %v1433_v21  ;;  %v1452_v41 = vmul.f32 %v1447_v18, %v1272_v12  ;;  %v1453_v42 = vmul.f32 %v1451_v29, %v1273_v13 }
 0x6b3   : > { %v1441_v27 = vmul.f32 %v1436_v25, %v3074_v31  ;;  %v1442_v28 = vmul.f32 %v1440_v26, %v3076_v32 }
 0x6b5   : > { %v1490_v34 = vrot.slane %v1441_v27, 4  ;;  %v1491_v35 = vrot.slane %v1442_v28, 4 }
 0x6b7   : > { %v1504_v53 = vsel %vm817_vm4, %v1384_v54, %v1490_v34  ;;  %v1505_v56 = vsel %vm817_vm4, %v1385_v58, %v1491_v35 }
 0x6b8   : > { %v1422_v36 = vpop.permute.xlu0 %1421  ;;  %v1414_v14 = vpop.permute.xlu2 %1413 }
 0x6b9   : > { %v1425_v23 = vpop.permute.xlu1 %1424 }
 0x6ba   : > { %v1426_v9 = vsel %vm891_vm13, %v1425_v23, %v1422_v36  ;;  %v1429_v13 = vsel %vm891_vm13, %v1422_v36, %v1425_v23 }
 0x6bb   : > { %v1430_v10 = vmul.f32 %v1429_v13, %v1234_v47  ;;  %v1431_v61 = vmul.f32 %v1426_v9, %v1235_v48 }
 0x6bd   : > { %v1484_v20 = vrot.slane %v1430_v10, 4  ;;  %v1485_v21 = vrot.slane %v1431_v61, 4 }
 0x6c0   : > { %v1392_v54 = vpop.permute.xlu0 %1391 }
 0x6c1   : > { %v1457_v17 = vpop.permute.xlu1 %1456  ;;  %v1396_v11 = vsel %vm1172_vm11, %v1388_v51, %v1392_v54 }
 0x6c2   : > { %v1458_v30 = vsel %vm1282_vm7, %v1455_v6, %v1457_v17  ;;  %v1462_v33 = vsel %vm1282_vm7, %v1457_v17, %v1455_v6  ;;  %v1397_v47 = vmul.f32 %v1396_v11, %v1179_v52 }
 0x6c3   : > { %v1463_v37 = vmul.f32 %v1458_v30, %v3057_v16  ;;  %v1464_v38 = vmul.f32 %v1462_v33, %v3059_v5 }
 0x6c5   : > { %v1496_v44 = vrot.slane %v1463_v37, 4  ;;  %v1497_v49 = vrot.slane %v1464_v38, 4 }
 0x6c7   : > { %v1506_v55 = vsel %vm817_vm4, %v1452_v41, %v1496_v44  ;;  %v1507_v57 = vsel %vm817_vm4, %v1453_v42, %v1497_v49 }
 0x6c8   : > { %v1511_v59 = vpack.c.bf16 %v1506_v55, %v1504_v53  ;;  %v1512_v43 = vpack.c.bf16 %v1507_v57, %v1505_v56 }
 0x6c9   : > { %v1400_v1 = vpop.permute.xlu1 %1399 }
 0x6ca   : > { %v1404_v7 = vsel %vm834_vm8, %v1403_v63, %v1400_v1  ;;  %v1407_v12 = vsel %vm834_vm8, %v1400_v1, %v1403_v63  ;;  %1537 = vmatpush.bf16.msrb.mxu3 %v1511_v59  ;;  %1550 = vmatpush.bf16.msra.mxu0 %v1512_v43  ;;  %v1393_v63 = vsel %vm1172_vm11, %v1392_v54, %v1388_v51  ;;  %v1631_v59 = vld [vmem:[%s3297_s6 + $0x8] sm:$0xf]  ;;  %v1630_v43 = vld [vmem:[%s3297_s6] sm:$0xff] }
 0x6cb   : > { %v1408_v8 = vmul.f32 %v1407_v12, %v1197_v3  ;;  %v1409_v58 = vmul.f32 %v1404_v7, %v1198_v4  ;;  %v1398_v40 = vmul.f32 %v1393_v63, %v1180_v2 }
 0x6cd   : > { %v1478_v15 = vrot.slane %v1408_v8, 4  ;;  %v1479_v6 = vrot.slane %v1409_v58, 4 }
 0x6cf   : > { %v1500_v22 = vsel %vm817_vm4, %v1397_v47, %v1478_v15  ;;  %v1501_v24 = vsel %vm817_vm4, %v1398_v40, %v1479_v6  ;;  %v1938_v47 = vld [vmem:[#allocation16] sm:$0xf]  ;;  %v1956_v40 = vld [vmem:[#allocation16] sm:$0x30] }
 0x6d1   : > { %v1411_v19 = vpop.permute.xlu1 %1410 }
 0x6d2   : > { %v1415_v3 = vsel %vm1208_vm10, %v1414_v14, %v1411_v19  ;;  %v1418_v62 = vsel %vm1208_vm10, %v1411_v19, %v1414_v14 }
 0x6d3   : > { %v1419_v48 = vmul.f32 %v1418_v62, %v1216_v45  ;;  %v1420_v4 = vmul.f32 %v1415_v3, %v1217_v46  ;;  %v1519_v45 = vpop.permute.xlu0 %1518 }
 0x6d5   : > { %v1502_v23 = vsel %vm817_vm4, %v1419_v48, %v1484_v20  ;;  %v1503_v25 = vsel %vm817_vm4, %v1420_v4, %v1485_v21 }
 0x6d6   : > { %v1509_v26 = vpack.c.bf16 %v1502_v23, %v1500_v22  ;;  %v1510_v27 = vpack.c.bf16 %v1503_v25, %v1501_v24  ;;  %v1939_v24 = vor.u32 %v1956_v40, %v1938_v47 }
 0x6d8   : > { %1538 = vmatpush.bf16.msrb.mxu3 %v1509_v26  ;;  %1551 = vmatpush.bf16.msra.mxu0 %v1510_v27 }
 0x6db   : > { %1934 = vmatmul.msk.bf16.vlgmr.msrb.gmra.mxu3 %vm1521_vm2, %v1508_v60  ;;  %1935 = vmatmul.msk.bf16.vlgmr.msra.gmra.mxu0 %vm1521_vm2, %v1508_v60 }
 0x758   : > { %v1553_v52 = vpop.f32.mrf.mxu0 }
 0x759   : > { %v1554_v39 = vadd.f32 %v1553_v52, %v1519_v45 }
 0x75b   : > { %v1560_v46 = vmul.f32 0.044715, %v1554_v39  ;;  %v1558_v44 = vmul.f32 0.5, %v1554_v39 }
 0x75d   : > { %v1562_v2 = vmul.f32 %v1560_v46, %v1554_v39 }
 0x75e   : > { %v1540_v28 = vpop.f32.mrf.mxu3 }
 0x75f   : > { %v1564_v17 = vmul.f32 %v1562_v2, %v1554_v39  ;;  %v1541_v18 = vadd.f32 %v1540_v28, %v1519_v45 }
 0x760   : > { %v1555_v29 = vpop.f32.mrf.mxu0 }
 0x761   : > { %v1559_v30 = vmul.f32 0.044715, %v1541_v18  ;;  %v1566_v33 = vadd.f32 %v1564_v17, %v1554_v39  ;;  %v1557_v55 = vmul.f32 0.5, %v1541_v18 }
 0x763   : > { %v1561_v34 = vmul.f32 %v1559_v30, %v1541_v18  ;;  %v1568_v35 = vmul.f32 0.7978846, %v1566_v33 }
 0x765   : > { %v1563_v36 = vmul.f32 %v1561_v34, %v1541_v18  ;;  %2162 = vtanh.f32 %v1568_v35 }
 0x766   : > { %v1542_v37 = vpop.f32.mrf.mxu3 }
 0x767   : > { %v1565_v38 = vadd.f32 %v1563_v36, %v1541_v18 }
 0x769   : > { %v1567_v41 = vmul.f32 0.7978846, %v1565_v38 }
 0x76b   : > { %v2163_v42 = vpop.eup %2162  ;;  %2164 = vtanh.f32 %v1567_v41 }
 0x76c   : > { %v1572_v49 = vadd.f32 1.0, %v2163_v42 }
 0x76e   : > { %v1574_v51 = vmul.f32 %v1572_v49, %v1558_v44 }
 0x770   : > { %1579 = vrot.lane.b32.xlu2 %v1574_v51, %s2626_s0 }
 0x771   : > { %v2165_v53 = vpop.eup %2164 }
 0x772   : > { %v1571_v56 = vadd.f32 1.0, %v2165_v53 }
 0x774   : > { %v1573_v57 = vmul.f32 %v1571_v56, %v1557_v55 }
 0x776   : > { %1599 = vrot.lane.b32.xlu0 %v1573_v57, %s2635_s23  ;;  %1577 = vrot.lane.b32.xlu1 %v1573_v57, %s2626_s0  ;;  %s1944_s0 = sshll.u32 %s3304_s18, 5 }
 0x777   : > { %s735_s28 = scalar_lea.vmem %s3298_s22, %s1944_s0 }
 0x778   : > { %1588 = vrot.lane.b32.xlu2 %v1573_v57, %s3293_s3 }
 0x77e   : > { %1590 = vrot.lane.b32.xlu0 %v1574_v51, %s3293_s3  ;;  %1601 = vrot.lane.b32.xlu1 %v1574_v51, %s2635_s23 }
 0x780   : > { %1639 = vperm.xlu2 %2141, %v1631_v59  }
 0x786   : > { %1634 = vperm.xlu1 %2142, %v1630_v43  }
 0x7ca   : > { %v1580_v1 = vpop.permute.xlu2 %1579 }
 0x7d2   : > { %v1589_v58 = vpop.permute.xlu2 %1588 }
 0x7da   : > { %v1640_v60 = vpop.permute.xlu2 %1639 }
 0x7e8   : > { %v1600_v7 = vpop.permute.xlu0 %1599  ;;  %v1578_v12 = vpop.permute.xlu1 %1577 }
 0x7e9   : > { %v1581_v9 = vsel %vm1244_vm9, %v1578_v12, %v1580_v1  ;;  %v1585_v13 = vsel %vm1244_vm9, %v1580_v1, %v1578_v12 }
 0x7ea   : > { %v1586_v54 = vmul.f32 %v1581_v9, %v3074_v31  ;;  %v1587_v8 = vmul.f32 %v1585_v13, %v3076_v32 }
 0x7ec   : > { %v1612_v6 = vrot.slane %v1586_v54, 4  ;;  %v1613_v19 = vrot.slane %v1587_v8, 4 }
 0x7ee   : > { %v1622_v48 = vsel %vm817_vm4, %v1573_v57, %v1612_v6  ;;  %v1623_v4 = vsel %vm817_vm4, %v1574_v51, %v1613_v19 }
 0x7f0   : > { %v1591_v10 = vpop.permute.xlu0 %1590  ;;  %v1602_v61 = vpop.permute.xlu1 %1601 }
 0x7f1   : > { %v1592_v63 = vsel %vm1282_vm7, %v1589_v58, %v1591_v10  ;;  %v1596_v11 = vsel %vm1282_vm7, %v1591_v10, %v1589_v58  ;;  %v1603_v14 = vsel %vm1301_vm5, %v1600_v7, %v1602_v61  ;;  %v1607_v15 = vsel %vm1301_vm5, %v1602_v61, %v1600_v7 }
 0x7f2   : > { %v1608_v20 = vmul.f32 %v1603_v14, %v3043_v0  ;;  %v1609_v21 = vmul.f32 %v1607_v15, %v3045_v50  ;;  %v1597_v31 = vmul.f32 %v1592_v63, %v3057_v16  ;;  %v1598_v32 = vmul.f32 %v1596_v11, %v3059_v5 }
 0x7f4   : > { %v1618_v3 = vrot.slane %v1608_v20, 4  ;;  %v1619_v62 = vrot.slane %v1609_v21, 4 }
 0x7f6   : > { %v1624_v22 = vsel %vm817_vm4, %v1597_v31, %v1618_v3  ;;  %v1625_v0 = vsel %vm817_vm4, %v1598_v32, %v1619_v62 }
 0x7f7   : > { %v1628_v23 = vpack.c.bf16 %v1624_v22, %v1622_v48  ;;  %v1629_v50 = vpack.c.bf16 %v1625_v0, %v1623_v4 }
 0x7f8   : > { %v1635_v16 = vpop.permute.xlu1 %1634 }
 0x7f9   : > { %1657 = vmatpush.bf16.msra.mxu3 %v1628_v23  ;;  %1671 = vmatpush.bf16.msrb.mxu0 %v1629_v50 }
 0x7fc   : > { %1940 = vmatmul.msk.bf16.vlgmr.msra.gmra.mxu3 %vm834_vm8, %v1939_v24  ;;  %1941 = vmatmul.msk.bf16.vlgmr.msrb.gmra.mxu0 %vm834_vm8, %v1939_v24 }
 0x879   : > { %v1673_v5 = vpop.f32.mrf.mxu0 }
 0x87a   : > { %v1674_v25 = vadd.f32 %v1673_v5, %v1635_v16 }
 0x87c   : > { %2166 = vtanh.f32 %v1674_v25 }
 0x87f   : > { %v1659_v26 = vpop.f32.mrf.mxu3 }
 0x880   : > { %v1660_v27 = vadd.f32 %v1659_v26, %v1635_v16 }
 0x881   : > { %v1675_v45 = vpop.f32.mrf.mxu0 }
 0x882   : > { %v2167_v52 = vpop.eup %2166  ;;  %2168 = vtanh.f32 %v1660_v27  ;;  %v1676_v39 = vadd.f32 %v1675_v45, %v1640_v60 }
 0x883   : > { %1683 = vst [vmem:[%s735_s28 + $0x8] sm:$0xff] %v2167_v52 }
 0x884   : > { %2170 = vtanh.f32 %v1676_v39 }
 0x887   : > { %v1661_v46 = vpop.f32.mrf.mxu3 }
 0x888   : > { %v2169_v2 = vpop.eup %2168  ;;  %v1662_v28 = vadd.f32 %v1661_v46, %v1640_v60 }
 0x889   : > { %1682 = vst [vmem:[%s735_s28] sm:$0xff] %v2169_v2 }
 0x88a   : > { %v2171_v17 = vpop.eup %2170  ;;  %2172 = vtanh.f32 %v1662_v28 }
 0x88b   : > { %1685 = vst [vmem:[%s735_s28 + $0x18] sm:$0xf] %v2171_v17 }
 0x890   : > { %v2173_v18 = vpop.eup %2172 }
 0x891   : > { %1684 = vst [vmem:[%s735_s28 + $0x10] sm:$0xf] %v2173_v18 }
 0x892 PF: > { %p33_p3 = scmp.ge.s32.totalorder %s2823_s1, 4   ;;  %s3299_s24 = smov %s2584_s25 }
 0x893   : > { %s3300_s25 = smov %s2588_s26  ;;  %s3301_s26 = smov %s2834_s10 }
 0x894   : > { %s3302_s27 = smov %s2823_s1  ;;  %35 = sbr.rel (!%p33_p3) target bundleno = 20 (0x14), region = 179 }
 0x899   :  { %1707 = vsyncpa [#allocation3], 1 }
 0x89a   :  { %1709 = vsyncpa [#allocation3 + $0x1], 1 }
 0x89b   :  { %1710 = vsyncpa [#allocation5], 1 }
 0x89c   :  { %1711 = vsyncpa [#allocation8], 1 }
 0x89d   :  { %1712 = vsyncpa [#allocation11], 1 }
 0x89e   :  { %1713 = vsyncpa [#allocation14], 1 }
 0x89f   :  { %1714 = vsyncpa [#allocation17], 1 }
 0x8a0   :  { %1715 = vsyncpa [#allocation20], 1 }

</bundles_post_ra>
